<compile_context>
chip_gen: v7x
topology: tpu7x:2x2x1
jax: 0.10.0
libtpu: 0.0.40
codegen_flags: <defaults>
</compile_context>

<pallas_src>
import jax
import jax.numpy as jnp
from jax import lax
from jax.experimental import pallas as pl
from jax.experimental.pallas import tpu as pltpu

EPS = 1e-5


# ---------------- Pallas kernels ----------------

def _conv1_kernel(x_ref, w_ref, y_ref, s_ref):
    """One temporal tap of conv1 (3x3x3) + BN1 partial-stat emission.

    x_ref: (1, 1, H+2, W+2, C)  bf16  padded input, depth slice (d + dt)
    w_ref: (3, 9, C, Co)        bf16  conv1 weights [dt, dh*3+dw, cin, cout]
    y_ref: (1, 1, H*W, Co)      f32   pre-BN conv1 output (accumulated over dt)
    s_ref: (1, 1, 2, Co)        f32   per-plane [sum; sum-of-squares]
    """
    dt = pl.program_id(2)
    hp, wp, cin = x_ref.shape[2], x_ref.shape[3], x_ref.shape[4]
    h, w = hp - 2, wp - 2
    co = y_ref.shape[3]

    x = x_ref[0, 0]                      # (H+2, W+2, C) bf16
    wt = w_ref[dt]                       # (9, C, Co)    bf16, VMEM-resident weights

    acc = jnp.zeros((h * w, co), jnp.float32)
    for i in range(9):                   # unrolled spatial taps, in-VMEM shifts
        dh, dw = i // 3, i % 3
        patch = x[dh:dh + h, dw:dw + w, :].reshape(h * w, cin)
        acc = acc + jnp.dot(patch, wt[i], preferred_element_type=jnp.float32)

    @pl.when(dt == 0)
    def _():
        y_ref[0, 0] = jnp.zeros((h * w, co), jnp.float32)

    y_ref[0, 0] += acc

    @pl.when(dt == pl.num_programs(2) - 1)
    def _():
        y = y_ref[0, 0]
        s_ref[0, 0, 0:1, :] = jnp.sum(y, axis=0, keepdims=True)
        s_ref[0, 0, 1:2, :] = jnp.sum(y * y, axis=0, keepdims=True)


def _conv2_kernel(y1_ref, w_ref, p_ref, y_ref, s_ref):
    """Fused bn1+relu (folded scale/shift FMA) + conv2 (1x3x3) + BN2 partial stats.

    y1_ref: (1, 1, H+2, W+2, C) f32   pre-BN1 conv1 output, zero-padded spatially
    w_ref:  (9, C, Co)          bf16  conv2 weights
    p_ref:  (2, C)              f32   bn1 folded [scale; shift]
    y_ref:  (1, 1, H*W, Co)     f32   pre-BN2 conv2 output
    s_ref:  (1, 1, 2, Co)       f32
    """
    hp, wp, cin = y1_ref.shape[2], y1_ref.shape[3], y1_ref.shape[4]
    h, w = hp - 2, wp - 2
    co = y_ref.shape[3]

    scale = p_ref[0:1, :].reshape(1, 1, cin)
    shift = p_ref[1:2, :].reshape(1, 1, cin)
    a = jnp.maximum(y1_ref[0, 0] * scale + shift, 0.0)       # bn1 + relu (f32)

    # keep the zero spatial halo exactly zero after the affine+relu
    hh = lax.broadcasted_iota(jnp.int32, (hp, wp, 1), 0)
    ww = lax.broadcasted_iota(jnp.int32, (hp, wp, 1), 1)
    interior = (hh >= 1) & (hh <= h) & (ww >= 1) & (ww <= w)
    a = jnp.where(interior, a, 0.0).astype(jnp.bfloat16)

    acc = jnp.zeros((h * w, co), jnp.float32)
    for i in range(9):
        dh, dw = i // 3, i % 3
        patch = a[dh:dh + h, dw:dw + w, :].reshape(h * w, cin)
        acc = acc + jnp.dot(patch, w_ref[i], preferred_element_type=jnp.float32)

    y_ref[0, 0] = acc
    s_ref[0, 0, 0:1, :] = jnp.sum(acc, axis=0, keepdims=True)
    s_ref[0, 0, 1:2, :] = jnp.sum(acc * acc, axis=0, keepdims=True)


def _bn_add_relu_kernel(y_ref, r_ref, p_ref, o_ref):
    """Fused bn2 (folded scale/shift) + identity residual + relu."""
    scale = p_ref[0:1, :]                # (1, C)
    shift = p_ref[1:2, :]
    o_ref[0, 0] = jnp.maximum(y_ref[0, 0] * scale + shift + r_ref[0, 0], 0.0)


# ---------------- pallas_call wrappers ----------------

def _conv1_bn_stats(xp, w1r, N, D, H, W, C, Co):
    return pl.pallas_call(
        _conv1_kernel,
        out_shape=(jax.ShapeDtypeStruct((N, D, H * W, Co), jnp.float32),
                   jax.ShapeDtypeStruct((N, D, 2, Co), jnp.float32)),
        grid=(N, D, 3),
        in_specs=[
            pl.BlockSpec((1, 1, H + 2, W + 2, C),
                         lambda n, d, t: (n, d + t, 0, 0, 0)),
            pl.BlockSpec((3, 9, C, Co), lambda n, d, t: (0, 0, 0, 0)),
        ],
        out_specs=(
            pl.BlockSpec((1, 1, H * W, Co), lambda n, d, t: (n, d, 0, 0)),
            pl.BlockSpec((1, 1, 2, Co), lambda n, d, t: (n, d, 0, 0)),
        ),
        compiler_params=pltpu.CompilerParams(
            dimension_semantics=("parallel", "parallel", "arbitrary")),
    )(xp, w1r)


def _conv2_bn_stats(y1p, w2r, bn1p, N, D, H, W, C):
    return pl.pallas_call(
        _conv2_kernel,
        out_shape=(jax.ShapeDtypeStruct((N, D, H * W, C), jnp.float32),
                   jax.ShapeDtypeStruct((N, D, 2, C), jnp.float32)),
        grid=(N, D),
        in_specs=[
            pl.BlockSpec((1, 1, H + 2, W + 2, C),
                         lambda n, d: (n, d, 0, 0, 0)),
            pl.BlockSpec((9, C, C), lambda n, d: (0, 0, 0)),
            pl.BlockSpec((2, C), lambda n, d: (0, 0)),
        ],
        out_specs=(
            pl.BlockSpec((1, 1, H * W, C), lambda n, d: (n, d, 0, 0)),
            pl.BlockSpec((1, 1, 2, C), lambda n, d: (n, d, 0, 0)),
        ),
        compiler_params=pltpu.CompilerParams(
            dimension_semantics=("parallel", "parallel")),
    )(y1p, w2r, bn1p)


def _bn2_add_relu(y2, res, bn2p, N, D, H, W, C):
    return pl.pallas_call(
        _bn_add_relu_kernel,
        out_shape=jax.ShapeDtypeStruct((N, D, H * W, C), jnp.float32),
        grid=(N, D),
        in_specs=[
            pl.BlockSpec((1, 1, H * W, C), lambda n, d: (n, d, 0, 0)),
            pl.BlockSpec((1, 1, H * W, C), lambda n, d: (n, d, 0, 0)),
            pl.BlockSpec((2, C), lambda n, d: (0, 0)),
        ],
        out_specs=pl.BlockSpec((1, 1, H * W, C), lambda n, d: (n, d, 0, 0)),
        compiler_params=pltpu.CompilerParams(
            dimension_semantics=("parallel", "parallel")),
    )(y2, res, bn2p)


# ---------------- forward (layout glue + BN stat finalize) ----------------

def basic_block_forward(x_ncdhw, w1, w2, g1, b1, g2, b2):
    """x: (N, C, D, H, W) f32. w1: (C, C, 3, 3, 3), w2: (C, C, 1, 3, 3)."""
    x = jnp.transpose(x_ncdhw, (0, 2, 3, 4, 1)).astype(jnp.float32)   # NDHWC
    N, D, H, W, C = x.shape
    Co = w1.shape[0]
    assert Co == C, "identity residual (downsample=None) requires inplanes == planes"
    cnt = float(N * D * H * W)

    # ---- stage 1: conv1 (3x3x3, pad [1,1,1]) + BN1 batch statistics ----
    xp = jnp.pad(x, ((0, 0), (1, 1), (1, 1), (1, 1), (0, 0))).astype(jnp.bfloat16)
    w1r = jnp.transpose(w1, (2, 3, 4, 1, 0)).reshape(3, 9, C, Co).astype(jnp.bfloat16)
    y1, s1 = _conv1_bn_stats(xp, w1r, N, D, H, W, C, Co)

    sum1 = jnp.sum(s1[:, :, 0, :], axis=(0, 1))
    sq1 = jnp.sum(s1[:, :, 1, :], axis=(0, 1))
    mean1 = sum1 / cnt
    var1 = jnp.maximum(sq1 / cnt - mean1 * mean1, 0.0)        # biased batch variance
    scale1 = g1 * lax.rsqrt(var1 + EPS)
    shift1 = b1 - mean1 * scale1
    bn1p = jnp.stack([scale1, shift1], axis=0)                # (2, C) folded affine

    # ---- stage 2: fused bn1+relu + conv2 (1x3x3, pad [0,1,1]) + BN2 stats ----
    y1p = jnp.pad(y1.reshape(N, D, H, W, Co),
                  ((0, 0), (0, 0), (1, 1), (1, 1), (0, 0)))
    w2r = jnp.transpose(w2, (2, 3, 4, 1, 0)).reshape(9, Co, Co).astype(jnp.bfloat16)
    y2, s2 = _conv2_bn_stats(y1p, w2r, bn1p, N, D, H, W, Co)

    sum2 = jnp.sum(s2[:, :, 0, :], axis=(0, 1))
    sq2 = jnp.sum(s2[:, :, 1, :], axis=(0, 1))
    mean2 = sum2 / cnt
    var2 = jnp.maximum(sq2 / cnt - mean2 * mean2, 0.0)
    scale2 = g2 * lax.rsqrt(var2 + EPS)
    shift2 = b2 - mean2 * scale2
    bn2p = jnp.stack([scale2, shift2], axis=0)

    # ---- stage 3: fused bn2 + identity residual + relu ----
    res = x.reshape(N, D, H * W, C)
    out = _bn2_add_relu(y2, res, bn2p, N, D, H, W, Co)

    return jnp.transpose(out.reshape(N, D, H, W, Co), (0, 4, 1, 2, 3))  # NCDHW


# ---------------- pure-JAX references (self-check) ----------------

def _bn_train(y, g, b):
    mean = y.mean(axis=(0, 2, 3, 4), keepdims=True)
    var = ((y - mean) ** 2).mean(axis=(0, 2, 3, 4), keepdims=True)
    return ((y - mean) * lax.rsqrt(var + EPS) * g.reshape(1, -1, 1, 1, 1)
            + b.reshape(1, -1, 1, 1, 1))


def ref_forward(x, w1, w2, g1, b1, g2, b2, simulate_bf16=False):
    dn = ('NCDHW', 'OIDHW', 'NCDHW')
    prec = lax.Precision.HIGHEST

    def q(a):
        return a.astype(jnp.bfloat16).astype(jnp.float32) if simulate_bf16 else a

    y = lax.conv_general_dilated(q(x), q(w1), (1, 1, 1),
                                 ((1, 1), (1, 1), (1, 1)),
                                 dimension_numbers=dn, precision=prec)
    y = jnp.maximum(_bn_train(y, g1, b1), 0.0)
    y = lax.conv_general_dilated(q(y), q(w2), (1, 1, 1),
                                 ((0, 0), (1, 1), (1, 1)),
                                 dimension_numbers=dn, precision=prec)
    y = _bn_train(y, g2, b2) + x
    return jnp.maximum(y, 0.0)


if __name__ == "__main__":
    key = jax.random.PRNGKey(0)
    k_x, k_w1, k_w2 = jax.random.split(key, 3)

    N, C, D, H, W = 2, 4, 4, 8, 8            # inplanes = planes = 4
    x = jax.random.normal(k_x, (N, C, D, H, W), dtype=jnp.float32)
    w1 = jax.random.normal(k_w1, (C, C, 3, 3, 3), dtype=jnp.float32) * 0.1
    w2 = jax.random.normal(k_w2, (C, C, 1, 3, 3), dtype=jnp.float32) * 0.1
    g1 = jnp.ones((C,), jnp.float32); b1 = jnp.zeros((C,), jnp.float32)
    g2 = jnp.ones((C,), jnp.float32); b2 = jnp.zeros((C,), jnp.float32)

    fwd = jax.jit(basic_block_forward)
    out = fwd(x, w1, w2, g1, b1, g2, b2)
    jax.block_until_ready(out)
    assert out.shape == (N, C, D, H, W)

    # tight check vs. a reference that mimics the intentional bf16 MXU inputs
    ref_b = ref_forward(x, w1, w2, g1, b1, g2, b2, simulate_bf16=True)
    err_b = float(jnp.max(jnp.abs(out - ref_b)))
    assert jnp.allclose(out, ref_b, atol=5e-3, rtol=5e-3), err_b

    # looser check vs. the full-f32 reference (bf16 matmul inputs are by design)
    ref_f = ref_forward(x, w1, w2, g1, b1, g2, b2, simulate_bf16=False)
    err_f = float(jnp.max(jnp.abs(out - ref_f)))
    assert jnp.allclose(out, ref_f, atol=5e-2, rtol=5e-2), err_f

    print("KERNEL_OK")
</pallas_src>

<mosaic_0001>
module attributes {stable_mosaic.version = 11 : i64} {
  func.func @_conv1_kernel(%arg0: i32, %arg1: i32, %arg2: i32, %arg3: memref<1x1x10x10x4xbf16, #tpu.memory_space<vmem>>, %arg4: memref<3x9x4x4xbf16, #tpu.memory_space<vmem>>, %arg5: memref<1x1x64x4xf32, #tpu.memory_space<vmem>>, %arg6: memref<1x1x2x4xf32, #tpu.memory_space<vmem>>) attributes {dimension_semantics = [#tpu.dimension_semantics<parallel>, #tpu.dimension_semantics<parallel>, #tpu.dimension_semantics<arbitrary>], iteration_bounds = array<i64: 2, 4, 3>, scalar_prefetch = 0 : i64, scratch_operands = 0 : i64, tpu.core_type = #tpu.core_type<tc>, window_params = [{transform_indices = @transform_0, window_bounds = array<i64: 1, 1, 10, 10, 4>}, {pipeline_mode = #tpu.pipeline_mode<synchronous>, transform_indices = @transform_1, window_bounds = array<i64: 3, 9, 4, 4>}, {transform_indices = @transform_2, window_bounds = array<i64: 1, 1, 64, 4>}, {transform_indices = @transform_3, window_bounds = array<i64: 1, 1, 2, 4>}]} {
    %c0 = arith.constant 0 : index
    %c0_0 = arith.constant 0 : index
    %c0_1 = arith.constant 0 : index
    %c0_2 = arith.constant 0 : index
    %c0_3 = arith.constant 0 : index
    %0 = vector.load %arg3[%c0, %c0_0, %c0_1, %c0_2, %c0_3] : memref<1x1x10x10x4xbf16, #tpu.memory_space<vmem>>, vector<1x1x10x10x4xbf16>
    %1 = vector.shape_cast %0 : vector<1x1x10x10x4xbf16> to vector<10x10x4xbf16>
    %2 = arith.index_cast %arg2 : i32 to index
    %c0_4 = arith.constant 0 : index
    %c0_5 = arith.constant 0 : index
    %c0_6 = arith.constant 0 : index
    %3 = vector.load %arg4[%2, %c0_4, %c0_5, %c0_6] : memref<3x9x4x4xbf16, #tpu.memory_space<vmem>>, vector<1x9x4x4xbf16>
    %4 = vector.shape_cast %3 : vector<1x9x4x4xbf16> to vector<9x4x4xbf16>
    %cst = arith.constant 0.000000e+00 : f32
    %5 = vector.broadcast %cst : f32 to vector<64x4xf32>
    %6 = vector.extract_strided_slice %1 {offsets = [0, 0, 0], sizes = [8, 8, 4], strides = [1, 1, 1]} : vector<10x10x4xbf16> to vector<8x8x4xbf16>
    %7 = vector.shape_cast %6 : vector<8x8x4xbf16> to vector<64x4xbf16>
    %8 = vector.extract_strided_slice %4 {offsets = [0, 0, 0], sizes = [1, 4, 4], strides = [1, 1, 1]} : vector<9x4x4xbf16> to vector<1x4x4xbf16>
    %9 = vector.shape_cast %8 : vector<1x4x4xbf16> to vector<4x4xbf16>
    %cst_7 = arith.constant dense<0.000000e+00> : vector<64x4xf32>
    %10 = tpu.matmul %7, %9, %cst_7 {dimension_numbers = #tpu.dot_dimension_numbers<[1], [0], [0], [1], [0, 0, 1, 1], [], []>} : vector<64x4xbf16>, vector<4x4xbf16>, vector<64x4xf32> -> vector<64x4xf32>
    %11 = arith.addf %5, %10 : vector<64x4xf32>
    %12 = vector.extract_strided_slice %1 {offsets = [0, 1, 0], sizes = [8, 8, 4], strides = [1, 1, 1]} : vector<10x10x4xbf16> to vector<8x8x4xbf16>
    %13 = vector.shape_cast %12 : vector<8x8x4xbf16> to vector<64x4xbf16>
    %14 = vector.extract_strided_slice %4 {offsets = [1, 0, 0], sizes = [1, 4, 4], strides = [1, 1, 1]} : vector<9x4x4xbf16> to vector<1x4x4xbf16>
    %15 = vector.shape_cast %14 : vector<1x4x4xbf16> to vector<4x4xbf16>
    %cst_8 = arith.constant dense<0.000000e+00> : vector<64x4xf32>
    %16 = tpu.matmul %13, %15, %cst_8 {dimension_numbers = #tpu.dot_dimension_numbers<[1], [0], [0], [1], [0, 0, 1, 1], [], []>} : vector<64x4xbf16>, vector<4x4xbf16>, vector<64x4xf32> -> vector<64x4xf32>
    %17 = arith.addf %11, %16 : vector<64x4xf32>
    %18 = vector.extract_strided_slice %1 {offsets = [0, 2, 0], sizes = [8, 8, 4], strides = [1, 1, 1]} : vector<10x10x4xbf16> to vector<8x8x4xbf16>
    %19 = vector.shape_cast %18 : vector<8x8x4xbf16> to vector<64x4xbf16>
    %20 = vector.extract_strided_slice %4 {offsets = [2, 0, 0], sizes = [1, 4, 4], strides = [1, 1, 1]} : vector<9x4x4xbf16> to vector<1x4x4xbf16>
    %21 = vector.shape_cast %20 : vector<1x4x4xbf16> to vector<4x4xbf16>
    %cst_9 = arith.constant dense<0.000000e+00> : vector<64x4xf32>
    %22 = tpu.matmul %19, %21, %cst_9 {dimension_numbers = #tpu.dot_dimension_numbers<[1], [0], [0], [1], [0, 0, 1, 1], [], []>} : vector<64x4xbf16>, vector<4x4xbf16>, vector<64x4xf32> -> vector<64x4xf32>
    %23 = arith.addf %17, %22 : vector<64x4xf32>
    %24 = vector.extract_strided_slice %1 {offsets = [1, 0, 0], sizes = [8, 8, 4], strides = [1, 1, 1]} : vector<10x10x4xbf16> to vector<8x8x4xbf16>
    %25 = vector.shape_cast %24 : vector<8x8x4xbf16> to vector<64x4xbf16>
    %26 = vector.extract_strided_slice %4 {offsets = [3, 0, 0], sizes = [1, 4, 4], strides = [1, 1, 1]} : vector<9x4x4xbf16> to vector<1x4x4xbf16>
    %27 = vector.shape_cast %26 : vector<1x4x4xbf16> to vector<4x4xbf16>
    %cst_10 = arith.constant dense<0.000000e+00> : vector<64x4xf32>
    %28 = tpu.matmul %25, %27, %cst_10 {dimension_numbers = #tpu.dot_dimension_numbers<[1], [0], [0], [1], [0, 0, 1, 1], [], []>} : vector<64x4xbf16>, vector<4x4xbf16>, vector<64x4xf32> -> vector<64x4xf32>
    %29 = arith.addf %23, %28 : vector<64x4xf32>
    %30 = vector.extract_strided_slice %1 {offsets = [1, 1, 0], sizes = [8, 8, 4], strides = [1, 1, 1]} : vector<10x10x4xbf16> to vector<8x8x4xbf16>
    %31 = vector.shape_cast %30 : vector<8x8x4xbf16> to vector<64x4xbf16>
    %32 = vector.extract_strided_slice %4 {offsets = [4, 0, 0], sizes = [1, 4, 4], strides = [1, 1, 1]} : vector<9x4x4xbf16> to vector<1x4x4xbf16>
    %33 = vector.shape_cast %32 : vector<1x4x4xbf16> to vector<4x4xbf16>
    %cst_11 = arith.constant dense<0.000000e+00> : vector<64x4xf32>
    %34 = tpu.matmul %31, %33, %cst_11 {dimension_numbers = #tpu.dot_dimension_numbers<[1], [0], [0], [1], [0, 0, 1, 1], [], []>} : vector<64x4xbf16>, vector<4x4xbf16>, vector<64x4xf32> -> vector<64x4xf32>
    %35 = arith.addf %29, %34 : vector<64x4xf32>
    %36 = vector.extract_strided_slice %1 {offsets = [1, 2, 0], sizes = [8, 8, 4], strides = [1, 1, 1]} : vector<10x10x4xbf16> to vector<8x8x4xbf16>
    %37 = vector.shape_cast %36 : vector<8x8x4xbf16> to vector<64x4xbf16>
    %38 = vector.extract_strided_slice %4 {offsets = [5, 0, 0], sizes = [1, 4, 4], strides = [1, 1, 1]} : vector<9x4x4xbf16> to vector<1x4x4xbf16>
    %39 = vector.shape_cast %38 : vector<1x4x4xbf16> to vector<4x4xbf16>
    %cst_12 = arith.constant dense<0.000000e+00> : vector<64x4xf32>
    %40 = tpu.matmul %37, %39, %cst_12 {dimension_numbers = #tpu.dot_dimension_numbers<[1], [0], [0], [1], [0, 0, 1, 1], [], []>} : vector<64x4xbf16>, vector<4x4xbf16>, vector<64x4xf32> -> vector<64x4xf32>
    %41 = arith.addf %35, %40 : vector<64x4xf32>
    %42 = vector.extract_strided_slice %1 {offsets = [2, 0, 0], sizes = [8, 8, 4], strides = [1, 1, 1]} : vector<10x10x4xbf16> to vector<8x8x4xbf16>
    %43 = vector.shape_cast %42 : vector<8x8x4xbf16> to vector<64x4xbf16>
    %44 = vector.extract_strided_slice %4 {offsets = [6, 0, 0], sizes = [1, 4, 4], strides = [1, 1, 1]} : vector<9x4x4xbf16> to vector<1x4x4xbf16>
    %45 = vector.shape_cast %44 : vector<1x4x4xbf16> to vector<4x4xbf16>
    %cst_13 = arith.constant dense<0.000000e+00> : vector<64x4xf32>
    %46 = tpu.matmul %43, %45, %cst_13 {dimension_numbers = #tpu.dot_dimension_numbers<[1], [0], [0], [1], [0, 0, 1, 1], [], []>} : vector<64x4xbf16>, vector<4x4xbf16>, vector<64x4xf32> -> vector<64x4xf32>
    %47 = arith.addf %41, %46 : vector<64x4xf32>
    %48 = vector.extract_strided_slice %1 {offsets = [2, 1, 0], sizes = [8, 8, 4], strides = [1, 1, 1]} : vector<10x10x4xbf16> to vector<8x8x4xbf16>
    %49 = vector.shape_cast %48 : vector<8x8x4xbf16> to vector<64x4xbf16>
    %50 = vector.extract_strided_slice %4 {offsets = [7, 0, 0], sizes = [1, 4, 4], strides = [1, 1, 1]} : vector<9x4x4xbf16> to vector<1x4x4xbf16>
    %51 = vector.shape_cast %50 : vector<1x4x4xbf16> to vector<4x4xbf16>
    %cst_14 = arith.constant dense<0.000000e+00> : vector<64x4xf32>
    %52 = tpu.matmul %49, %51, %cst_14 {dimension_numbers = #tpu.dot_dimension_numbers<[1], [0], [0], [1], [0, 0, 1, 1], [], []>} : vector<64x4xbf16>, vector<4x4xbf16>, vector<64x4xf32> -> vector<64x4xf32>
    %53 = arith.addf %47, %52 : vector<64x4xf32>
    %54 = vector.extract_strided_slice %1 {offsets = [2, 2, 0], sizes = [8, 8, 4], strides = [1, 1, 1]} : vector<10x10x4xbf16> to vector<8x8x4xbf16>
    %55 = vector.shape_cast %54 : vector<8x8x4xbf16> to vector<64x4xbf16>
    %56 = vector.extract_strided_slice %4 {offsets = [8, 0, 0], sizes = [1, 4, 4], strides = [1, 1, 1]} : vector<9x4x4xbf16> to vector<1x4x4xbf16>
    %57 = vector.shape_cast %56 : vector<1x4x4xbf16> to vector<4x4xbf16>
    %cst_15 = arith.constant dense<0.000000e+00> : vector<64x4xf32>
    %58 = tpu.matmul %55, %57, %cst_15 {dimension_numbers = #tpu.dot_dimension_numbers<[1], [0], [0], [1], [0, 0, 1, 1], [], []>} : vector<64x4xbf16>, vector<4x4xbf16>, vector<64x4xf32> -> vector<64x4xf32>
    %59 = arith.addf %53, %58 : vector<64x4xf32>
    %c0_i32 = arith.constant 0 : i32
    %60 = arith.cmpi eq, %arg2, %c0_i32 : i32
    %61 = arith.extui %60 : i1 to i32
    %c0_i32_16 = arith.constant 0 : i32
    %62 = arith.cmpi ne, %61, %c0_i32_16 : i32
    scf.if %62 {
      %cst_26 = arith.constant 0.000000e+00 : f32
      %72 = vector.broadcast %cst_26 : f32 to vector<64x4xf32>
      %c0_27 = arith.constant 0 : index
      %c0_28 = arith.constant 0 : index
      %c0_29 = arith.constant 0 : index
      %c0_30 = arith.constant 0 : index
      %73 = vector.load %arg5[%c0_27, %c0_28, %c0_29, %c0_30] : memref<1x1x64x4xf32, #tpu.memory_space<vmem>>, vector<1x1x64x4xf32>
      %74 = vector.shape_cast %73 : vector<1x1x64x4xf32> to vector<64x4xf32>
      %75 = vector.shape_cast %72 : vector<64x4xf32> to vector<1x1x64x4xf32>
      tpu.vector_store %arg5[%c0_27, %c0_28, %c0_29, %c0_30], %75 {strides = array<i32>} : memref<1x1x64x4xf32, #tpu.memory_space<vmem>>, vector<1x1x64x4xf32>,
    } else {
    }
    %c0_17 = arith.constant 0 : index
    %c0_18 = arith.constant 0 : index
    %c0_19 = arith.constant 0 : index
    %c0_20 = arith.constant 0 : index
    %63 = vector.load %arg5[%c0_17, %c0_18, %c0_19, %c0_20] : memref<1x1x64x4xf32, #tpu.memory_space<vmem>>, vector<1x1x64x4xf32>
    %64 = vector.shape_cast %63 : vector<1x1x64x4xf32> to vector<64x4xf32>
    %65 = arith.addf %64, %59 : vector<64x4xf32>
    %c0_21 = arith.constant 0 : index
    %c0_22 = arith.constant 0 : index
    %c0_23 = arith.constant 0 : index
    %c0_24 = arith.constant 0 : index
    %66 = vector.load %arg5[%c0_21, %c0_22, %c0_23, %c0_24] : memref<1x1x64x4xf32, #tpu.memory_space<vmem>>, vector<1x1x64x4xf32>
    %67 = vector.shape_cast %66 : vector<1x1x64x4xf32> to vector<64x4xf32>
    %68 = vector.shape_cast %65 : vector<64x4xf32> to vector<1x1x64x4xf32>
    tpu.vector_store %arg5[%c0_21, %c0_22, %c0_23, %c0_24], %68 {strides = array<i32>} : memref<1x1x64x4xf32, #tpu.memory_space<vmem>>, vector<1x1x64x4xf32>,
    %c2_i32 = arith.constant 2 : i32
    %69 = arith.cmpi eq, %arg2, %c2_i32 : i32
    %70 = arith.extui %69 : i1 to i32
    %c0_i32_25 = arith.constant 0 : i32
    %71 = arith.cmpi ne, %70, %c0_i32_25 : i32
    scf.if %71 {
      %c0_26 = arith.constant 0 : index
      %c0_27 = arith.constant 0 : index
      %c0_28 = arith.constant 0 : index
      %c0_29 = arith.constant 0 : index
      %72 = vector.load %arg5[%c0_26, %c0_27, %c0_28, %c0_29] : memref<1x1x64x4xf32, #tpu.memory_space<vmem>>, vector<1x1x64x4xf32>
      %73 = vector.shape_cast %72 : vector<1x1x64x4xf32> to vector<64x4xf32>
      %cst_30 = arith.constant dense<0.000000e+00> : vector<4xf32>
      %74 = vector.multi_reduction <add>, %73, %cst_30 [0] : vector<64x4xf32> to vector<4xf32>
      %75 = vector.shape_cast %74 : vector<4xf32> to vector<1x4xf32>
      %c0_31 = arith.constant 0 : index
      %c0_32 = arith.constant 0 : index
      %c0_33 = arith.constant 0 : index
      %c0_34 = arith.constant 0 : index
      %76 = vector.load %arg6[%c0_31, %c0_32, %c0_33, %c0_34] : memref<1x1x2x4xf32, #tpu.memory_space<vmem>>, vector<1x1x1x4xf32>
      %77 = vector.shape_cast %76 : vector<1x1x1x4xf32> to vector<1x4xf32>
      %78 = vector.shape_cast %75 : vector<1x4xf32> to vector<1x1x1x4xf32>
      tpu.vector_store %arg6[%c0_31, %c0_32, %c0_33, %c0_34], %78 {strides = array<i32>} : memref<1x1x2x4xf32, #tpu.memory_space<vmem>>, vector<1x1x1x4xf32>,
      %79 = arith.mulf %73, %73 : vector<64x4xf32>
      %cst_35 = arith.constant dense<0.000000e+00> : vector<4xf32>
      %80 = vector.multi_reduction <add>, %79, %cst_35 [0] : vector<64x4xf32> to vector<4xf32>
      %81 = vector.shape_cast %80 : vector<4xf32> to vector<1x4xf32>
      %c0_36 = arith.constant 0 : index
      %c0_37 = arith.constant 0 : index
      %c1 = arith.constant 1 : index
      %c0_38 = arith.constant 0 : index
      %82 = vector.load %arg6[%c0_36, %c0_37, %c1, %c0_38] : memref<1x1x2x4xf32, #tpu.memory_space<vmem>>, vector<1x1x1x4xf32>
      %83 = vector.shape_cast %82 : vector<1x1x1x4xf32> to vector<1x4xf32>
      %84 = vector.shape_cast %81 : vector<1x4xf32> to vector<1x1x1x4xf32>
      tpu.vector_store %arg6[%c0_36, %c0_37, %c1, %c0_38], %84 {strides = array<i32>} : memref<1x1x2x4xf32, #tpu.memory_space<vmem>>, vector<1x1x1x4xf32>,
    } else {
    }
    return
  }
  func.func @transform_0(%arg0: i32, %arg1: i32, %arg2: i32) -> (i32, i32, i32, i32, i32) {
    %0 = arith.addi %arg1, %arg2 : i32
    %c0_i32 = arith.constant 0 : i32
    %c0_i32_0 = arith.constant 0 : i32
    %c0_i32_1 = arith.constant 0 : i32
    %c0_i32_2 = arith.constant 0 : i32
    return %arg0, %0, %c0_i32, %c0_i32_0, %c0_i32_1 : i32, i32, i32, i32, i32
  }
  func.func @transform_1(%arg0: i32, %arg1: i32, %arg2: i32) -> (i32, i32, i32, i32) {
    %c0_i32 = arith.constant 0 : i32
    %c0_i32_0 = arith.constant 0 : i32
    %c0_i32_1 = arith.constant 0 : i32
    %c0_i32_2 = arith.constant 0 : i32
    %c0_i32_3 = arith.constant 0 : i32
    return %c0_i32, %c0_i32_0, %c0_i32_1, %c0_i32_2 : i32, i32, i32, i32
  }
  func.func @transform_2(%arg0: i32, %arg1: i32, %arg2: i32) -> (i32, i32, i32, i32) {
    %c0_i32 = arith.constant 0 : i32
    %c0_i32_0 = arith.constant 0 : i32
    %c0_i32_1 = arith.constant 0 : i32
    return %arg0, %arg1, %c0_i32, %c0_i32_0 : i32, i32, i32, i32
  }
  func.func @transform_3(%arg0: i32, %arg1: i32, %arg2: i32) -> (i32, i32, i32, i32) {
    %c0_i32 = arith.constant 0 : i32
    %c0_i32_0 = arith.constant 0 : i32
    %c0_i32_1 = arith.constant 0 : i32
    return %arg0, %arg1, %c0_i32, %c0_i32_0 : i32, i32, i32, i32
  }
}

module attributes {stable_mosaic.version = 11 : i64} {
  func.func @_conv2_kernel(%arg0: i32, %arg1: i32, %arg2: memref<1x1x10x10x4xf32, #tpu.memory_space<vmem>>, %arg3: memref<9x4x4xbf16, #tpu.memory_space<vmem>>, %arg4: memref<2x4xf32, #tpu.memory_space<vmem>>, %arg5: memref<1x1x64x4xf32, #tpu.memory_space<vmem>>, %arg6: memref<1x1x2x4xf32, #tpu.memory_space<vmem>>) attributes {dimension_semantics = [#tpu.dimension_semantics<parallel>, #tpu.dimension_semantics<parallel>], iteration_bounds = array<i64: 2, 4>, scalar_prefetch = 0 : i64, scratch_operands = 0 : i64, tpu.core_type = #tpu.core_type<tc>, window_params = [{transform_indices = @transform_0, window_bounds = array<i64: 1, 1, 10, 10, 4>}, {pipeline_mode = #tpu.pipeline_mode<synchronous>, transform_indices = @transform_1, window_bounds = array<i64: 9, 4, 4>}, {pipeline_mode = #tpu.pipeline_mode<synchronous>, transform_indices = @transform_2, window_bounds = array<i64: 2, 4>}, {transform_indices = @transform_3, window_bounds = array<i64: 1, 1, 64, 4>}, {transform_indices = @transform_4, window_bounds = array<i64: 1, 1, 2, 4>}]} {
    %c0 = arith.constant 0 : index
    %c0_0 = arith.constant 0 : index
    %0 = vector.load %arg4[%c0, %c0_0] : memref<2x4xf32, #tpu.memory_space<vmem>>, vector<1x4xf32>
    %1 = vector.shape_cast %0 : vector<1x4xf32> to vector<1x1x4xf32>
    %c1 = arith.constant 1 : index
    %c0_1 = arith.constant 0 : index
    %2 = vector.load %arg4[%c1, %c0_1] : memref<2x4xf32, #tpu.memory_space<vmem>>, vector<1x4xf32>
    %3 = vector.shape_cast %2 : vector<1x4xf32> to vector<1x1x4xf32>
    %c0_2 = arith.constant 0 : index
    %c0_3 = arith.constant 0 : index
    %c0_4 = arith.constant 0 : index
    %c0_5 = arith.constant 0 : index
    %c0_6 = arith.constant 0 : index
    %4 = vector.load %arg2[%c0_2, %c0_3, %c0_4, %c0_5, %c0_6] : memref<1x1x10x10x4xf32, #tpu.memory_space<vmem>>, vector<1x1x10x10x4xf32>
    %5 = vector.shape_cast %4 : vector<1x1x10x10x4xf32> to vector<10x10x4xf32>
    %6 = vector.broadcast %1 : vector<1x1x4xf32> to vector<10x10x4xf32>
    %7 = arith.mulf %5, %6 : vector<10x10x4xf32>
    %8 = vector.broadcast %3 : vector<1x1x4xf32> to vector<10x10x4xf32>
    %9 = arith.addf %7, %8 : vector<10x10x4xf32>
    %cst = arith.constant 0.000000e+00 : f32
    %10 = vector.broadcast %cst : f32 to vector<10x10x4xf32>
    %11 = arith.maximumf %9, %10 : vector<10x10x4xf32>
    %12 = tpu.iota {dimensions = array<i32: 0>} : vector<10x10x1xi32>
    %13 = tpu.iota {dimensions = array<i32: 1>} : vector<10x10x1xi32>
    %c1_i32 = arith.constant 1 : i32
    %14 = vector.broadcast %c1_i32 : i32 to vector<10x10x1xi32>
    %15 = arith.cmpi sge, %12, %14 : vector<10x10x1xi32>
    %c8_i32 = arith.constant 8 : i32
    %16 = vector.broadcast %c8_i32 : i32 to vector<10x10x1xi32>
    %17 = arith.cmpi sle, %12, %16 : vector<10x10x1xi32>
    %18 = arith.andi %15, %17 : vector<10x10x1xi1>
    %c1_i32_7 = arith.constant 1 : i32
    %19 = vector.broadcast %c1_i32_7 : i32 to vector<10x10x1xi32>
    %20 = arith.cmpi sge, %13, %19 : vector<10x10x1xi32>
    %21 = arith.andi %18, %20 : vector<10x10x1xi1>
    %c8_i32_8 = arith.constant 8 : i32
    %22 = vector.broadcast %c8_i32_8 : i32 to vector<10x10x1xi32>
    %23 = arith.cmpi sle, %13, %22 : vector<10x10x1xi32>
    %24 = arith.andi %21, %23 : vector<10x10x1xi1>
    %cst_9 = arith.constant 0.000000e+00 : f32
    %25 = vector.shape_cast %24 : vector<10x10x1xi1> to vector<10x10x1xi1>
    %26 = vector.broadcast %25 : vector<10x10x1xi1> to vector<10x10x4xi1>
    %27 = vector.broadcast %cst_9 : f32 to vector<10x10x4xf32>
    %28 = arith.select %26, %11, %27 : vector<10x10x4xi1>, vector<10x10x4xf32>
    %29 = arith.truncf %28 : vector<10x10x4xf32> to vector<10x10x4xbf16>
    %cst_10 = arith.constant 0.000000e+00 : f32
    %30 = vector.broadcast %cst_10 : f32 to vector<64x4xf32>
    %31 = vector.extract_strided_slice %29 {offsets = [0, 0, 0], sizes = [8, 8, 4], strides = [1, 1, 1]} : vector<10x10x4xbf16> to vector<8x8x4xbf16>
    %32 = vector.shape_cast %31 : vector<8x8x4xbf16> to vector<64x4xbf16>
    %c0_11 = arith.constant 0 : index
    %c0_12 = arith.constant 0 : index
    %c0_13 = arith.constant 0 : index
    %33 = vector.load %arg3[%c0_11, %c0_12, %c0_13] : memref<9x4x4xbf16, #tpu.memory_space<vmem>>, vector<1x4x4xbf16>
    %34 = vector.shape_cast %33 : vector<1x4x4xbf16> to vector<4x4xbf16>
    %cst_14 = arith.constant dense<0.000000e+00> : vector<64x4xf32>
    %35 = tpu.matmul %32, %34, %cst_14 {dimension_numbers = #tpu.dot_dimension_numbers<[1], [0], [0], [1], [0, 0, 1, 1], [], []>} : vector<64x4xbf16>, vector<4x4xbf16>, vector<64x4xf32> -> vector<64x4xf32>
    %36 = arith.addf %30, %35 : vector<64x4xf32>
    %37 = vector.extract_strided_slice %29 {offsets = [0, 1, 0], sizes = [8, 8, 4], strides = [1, 1, 1]} : vector<10x10x4xbf16> to vector<8x8x4xbf16>
    %38 = vector.shape_cast %37 : vector<8x8x4xbf16> to vector<64x4xbf16>
    %c1_15 = arith.constant 1 : index
    %c0_16 = arith.constant 0 : index
    %c0_17 = arith.constant 0 : index
    %39 = vector.load %arg3[%c1_15, %c0_16, %c0_17] : memref<9x4x4xbf16, #tpu.memory_space<vmem>>, vector<1x4x4xbf16>
    %40 = vector.shape_cast %39 : vector<1x4x4xbf16> to vector<4x4xbf16>
    %cst_18 = arith.constant dense<0.000000e+00> : vector<64x4xf32>
    %41 = tpu.matmul %38, %40, %cst_18 {dimension_numbers = #tpu.dot_dimension_numbers<[1], [0], [0], [1], [0, 0, 1, 1], [], []>} : vector<64x4xbf16>, vector<4x4xbf16>, vector<64x4xf32> -> vector<64x4xf32>
    %42 = arith.addf %36, %41 : vector<64x4xf32>
    %43 = vector.extract_strided_slice %29 {offsets = [0, 2, 0], sizes = [8, 8, 4], strides = [1, 1, 1]} : vector<10x10x4xbf16> to vector<8x8x4xbf16>
    %44 = vector.shape_cast %43 : vector<8x8x4xbf16> to vector<64x4xbf16>
    %c2 = arith.constant 2 : index
    %c0_19 = arith.constant 0 : index
    %c0_20 = arith.constant 0 : index
    %45 = vector.load %arg3[%c2, %c0_19, %c0_20] : memref<9x4x4xbf16, #tpu.memory_space<vmem>>, vector<1x4x4xbf16>
    %46 = vector.shape_cast %45 : vector<1x4x4xbf16> to vector<4x4xbf16>
    %cst_21 = arith.constant dense<0.000000e+00> : vector<64x4xf32>
    %47 = tpu.matmul %44, %46, %cst_21 {dimension_numbers = #tpu.dot_dimension_numbers<[1], [0], [0], [1], [0, 0, 1, 1], [], []>} : vector<64x4xbf16>, vector<4x4xbf16>, vector<64x4xf32> -> vector<64x4xf32>
    %48 = arith.addf %42, %47 : vector<64x4xf32>
    %49 = vector.extract_strided_slice %29 {offsets = [1, 0, 0], sizes = [8, 8, 4], strides = [1, 1, 1]} : vector<10x10x4xbf16> to vector<8x8x4xbf16>
    %50 = vector.shape_cast %49 : vector<8x8x4xbf16> to vector<64x4xbf16>
    %c3 = arith.constant 3 : index
    %c0_22 = arith.constant 0 : index
    %c0_23 = arith.constant 0 : index
    %51 = vector.load %arg3[%c3, %c0_22, %c0_23] : memref<9x4x4xbf16, #tpu.memory_space<vmem>>, vector<1x4x4xbf16>
    %52 = vector.shape_cast %51 : vector<1x4x4xbf16> to vector<4x4xbf16>
    %cst_24 = arith.constant dense<0.000000e+00> : vector<64x4xf32>
    %53 = tpu.matmul %50, %52, %cst_24 {dimension_numbers = #tpu.dot_dimension_numbers<[1], [0], [0], [1], [0, 0, 1, 1], [], []>} : vector<64x4xbf16>, vector<4x4xbf16>, vector<64x4xf32> -> vector<64x4xf32>
    %54 = arith.addf %48, %53 : vector<64x4xf32>
    %55 = vector.extract_strided_slice %29 {offsets = [1, 1, 0], sizes = [8, 8, 4], strides = [1, 1, 1]} : vector<10x10x4xbf16> to vector<8x8x4xbf16>
    %56 = vector.shape_cast %55 : vector<8x8x4xbf16> to vector<64x4xbf16>
    %c4 = arith.constant 4 : index
    %c0_25 = arith.constant 0 : index
    %c0_26 = arith.constant 0 : index
    %57 = vector.load %arg3[%c4, %c0_25, %c0_26] : memref<9x4x4xbf16, #tpu.memory_space<vmem>>, vector<1x4x4xbf16>
    %58 = vector.shape_cast %57 : vector<1x4x4xbf16> to vector<4x4xbf16>
    %cst_27 = arith.constant dense<0.000000e+00> : vector<64x4xf32>
    %59 = tpu.matmul %56, %58, %cst_27 {dimension_numbers = #tpu.dot_dimension_numbers<[1], [0], [0], [1], [0, 0, 1, 1], [], []>} : vector<64x4xbf16>, vector<4x4xbf16>, vector<64x4xf32> -> vector<64x4xf32>
    %60 = arith.addf %54, %59 : vector<64x4xf32>
    %61 = vector.extract_strided_slice %29 {offsets = [1, 2, 0], sizes = [8, 8, 4], strides = [1, 1, 1]} : vector<10x10x4xbf16> to vector<8x8x4xbf16>
    %62 = vector.shape_cast %61 : vector<8x8x4xbf16> to vector<64x4xbf16>
    %c5 = arith.constant 5 : index
    %c0_28 = arith.constant 0 : index
    %c0_29 = arith.constant 0 : index
    %63 = vector.load %arg3[%c5, %c0_28, %c0_29] : memref<9x4x4xbf16, #tpu.memory_space<vmem>>, vector<1x4x4xbf16>
    %64 = vector.shape_cast %63 : vector<1x4x4xbf16> to vector<4x4xbf16>
    %cst_30 = arith.constant dense<0.000000e+00> : vector<64x4xf32>
    %65 = tpu.matmul %62, %64, %cst_30 {dimension_numbers = #tpu.dot_dimension_numbers<[1], [0], [0], [1], [0, 0, 1, 1], [], []>} : vector<64x4xbf16>, vector<4x4xbf16>, vector<64x4xf32> -> vector<64x4xf32>
    %66 = arith.addf %60, %65 : vector<64x4xf32>
    %67 = vector.extract_strided_slice %29 {offsets = [2, 0, 0], sizes = [8, 8, 4], strides = [1, 1, 1]} : vector<10x10x4xbf16> to vector<8x8x4xbf16>
    %68 = vector.shape_cast %67 : vector<8x8x4xbf16> to vector<64x4xbf16>
    %c6 = arith.constant 6 : index
    %c0_31 = arith.constant 0 : index
    %c0_32 = arith.constant 0 : index
    %69 = vector.load %arg3[%c6, %c0_31, %c0_32] : memref<9x4x4xbf16, #tpu.memory_space<vmem>>, vector<1x4x4xbf16>
    %70 = vector.shape_cast %69 : vector<1x4x4xbf16> to vector<4x4xbf16>
    %cst_33 = arith.constant dense<0.000000e+00> : vector<64x4xf32>
    %71 = tpu.matmul %68, %70, %cst_33 {dimension_numbers = #tpu.dot_dimension_numbers<[1], [0], [0], [1], [0, 0, 1, 1], [], []>} : vector<64x4xbf16>, vector<4x4xbf16>, vector<64x4xf32> -> vector<64x4xf32>
    %72 = arith.addf %66, %71 : vector<64x4xf32>
    %73 = vector.extract_strided_slice %29 {offsets = [2, 1, 0], sizes = [8, 8, 4], strides = [1, 1, 1]} : vector<10x10x4xbf16> to vector<8x8x4xbf16>
    %74 = vector.shape_cast %73 : vector<8x8x4xbf16> to vector<64x4xbf16>
    %c7 = arith.constant 7 : index
    %c0_34 = arith.constant 0 : index
    %c0_35 = arith.constant 0 : index
    %75 = vector.load %arg3[%c7, %c0_34, %c0_35] : memref<9x4x4xbf16, #tpu.memory_space<vmem>>, vector<1x4x4xbf16>
    %76 = vector.shape_cast %75 : vector<1x4x4xbf16> to vector<4x4xbf16>
    %cst_36 = arith.constant dense<0.000000e+00> : vector<64x4xf32>
    %77 = tpu.matmul %74, %76, %cst_36 {dimension_numbers = #tpu.dot_dimension_numbers<[1], [0], [0], [1], [0, 0, 1, 1], [], []>} : vector<64x4xbf16>, vector<4x4xbf16>, vector<64x4xf32> -> vector<64x4xf32>
    %78 = arith.addf %72, %77 : vector<64x4xf32>
    %79 = vector.extract_strided_slice %29 {offsets = [2, 2, 0], sizes = [8, 8, 4], strides = [1, 1, 1]} : vector<10x10x4xbf16> to vector<8x8x4xbf16>
    %80 = vector.shape_cast %79 : vector<8x8x4xbf16> to vector<64x4xbf16>
    %c8 = arith.constant 8 : index
    %c0_37 = arith.constant 0 : index
    %c0_38 = arith.constant 0 : index
    %81 = vector.load %arg3[%c8, %c0_37, %c0_38] : memref<9x4x4xbf16, #tpu.memory_space<vmem>>, vector<1x4x4xbf16>
    %82 = vector.shape_cast %81 : vector<1x4x4xbf16> to vector<4x4xbf16>
    %cst_39 = arith.constant dense<0.000000e+00> : vector<64x4xf32>
    %83 = tpu.matmul %80, %82, %cst_39 {dimension_numbers = #tpu.dot_dimension_numbers<[1], [0], [0], [1], [0, 0, 1, 1], [], []>} : vector<64x4xbf16>, vector<4x4xbf16>, vector<64x4xf32> -> vector<64x4xf32>
    %84 = arith.addf %78, %83 : vector<64x4xf32>
    %c0_40 = arith.constant 0 : index
    %c0_41 = arith.constant 0 : index
    %c0_42 = arith.constant 0 : index
    %c0_43 = arith.constant 0 : index
    %85 = vector.load %arg5[%c0_40, %c0_41, %c0_42, %c0_43] : memref<1x1x64x4xf32, #tpu.memory_space<vmem>>, vector<1x1x64x4xf32>
    %86 = vector.shape_cast %85 : vector<1x1x64x4xf32> to vector<64x4xf32>
    %87 = vector.shape_cast %84 : vector<64x4xf32> to vector<1x1x64x4xf32>
    tpu.vector_store %arg5[%c0_40, %c0_41, %c0_42, %c0_43], %87 {strides = array<i32>} : memref<1x1x64x4xf32, #tpu.memory_space<vmem>>, vector<1x1x64x4xf32>,
    %cst_44 = arith.constant dense<0.000000e+00> : vector<4xf32>
    %88 = vector.multi_reduction <add>, %84, %cst_44 [0] : vector<64x4xf32> to vector<4xf32>
    %89 = vector.shape_cast %88 : vector<4xf32> to vector<1x4xf32>
    %c0_45 = arith.constant 0 : index
    %c0_46 = arith.constant 0 : index
    %c0_47 = arith.constant 0 : index
    %c0_48 = arith.constant 0 : index
    %90 = vector.load %arg6[%c0_45, %c0_46, %c0_47, %c0_48] : memref<1x1x2x4xf32, #tpu.memory_space<vmem>>, vector<1x1x1x4xf32>
    %91 = vector.shape_cast %90 : vector<1x1x1x4xf32> to vector<1x4xf32>
    %92 = vector.shape_cast %89 : vector<1x4xf32> to vector<1x1x1x4xf32>
    tpu.vector_store %arg6[%c0_45, %c0_46, %c0_47, %c0_48], %92 {strides = array<i32>} : memref<1x1x2x4xf32, #tpu.memory_space<vmem>>, vector<1x1x1x4xf32>,
    %93 = arith.mulf %84, %84 : vector<64x4xf32>
    %cst_49 = arith.constant dense<0.000000e+00> : vector<4xf32>
    %94 = vector.multi_reduction <add>, %93, %cst_49 [0] : vector<64x4xf32> to vector<4xf32>
    %95 = vector.shape_cast %94 : vector<4xf32> to vector<1x4xf32>
    %c0_50 = arith.constant 0 : index
    %c0_51 = arith.constant 0 : index
    %c1_52 = arith.constant 1 : index
    %c0_53 = arith.constant 0 : index
    %96 = vector.load %arg6[%c0_50, %c0_51, %c1_52, %c0_53] : memref<1x1x2x4xf32, #tpu.memory_space<vmem>>, vector<1x1x1x4xf32>
    %97 = vector.shape_cast %96 : vector<1x1x1x4xf32> to vector<1x4xf32>
    %98 = vector.shape_cast %95 : vector<1x4xf32> to vector<1x1x1x4xf32>
    tpu.vector_store %arg6[%c0_50, %c0_51, %c1_52, %c0_53], %98 {strides = array<i32>} : memref<1x1x2x4xf32, #tpu.memory_space<vmem>>, vector<1x1x1x4xf32>,
    return
  }
  func.func @transform_0(%arg0: i32, %arg1: i32) -> (i32, i32, i32, i32, i32) {
    %c0_i32 = arith.constant 0 : i32
    %c0_i32_0 = arith.constant 0 : i32
    %c0_i32_1 = arith.constant 0 : i32
    %c0_i32_2 = arith.constant 0 : i32
    return %arg0, %arg1, %c0_i32, %c0_i32_0, %c0_i32_1 : i32, i32, i32, i32, i32
  }
  func.func @transform_1(%arg0: i32, %arg1: i32) -> (i32, i32, i32) {
    %c0_i32 = arith.constant 0 : i32
    %c0_i32_0 = arith.constant 0 : i32
    %c0_i32_1 = arith.constant 0 : i32
    %c0_i32_2 = arith.constant 0 : i32
    return %c0_i32, %c0_i32_0, %c0_i32_1 : i32, i32, i32
  }
  func.func @transform_2(%arg0: i32, %arg1: i32) -> (i32, i32) {
    %c0_i32 = arith.constant 0 : i32
    %c0_i32_0 = arith.constant 0 : i32
    %c0_i32_1 = arith.constant 0 : i32
    return %c0_i32, %c0_i32_0 : i32, i32
  }
  func.func @transform_3(%arg0: i32, %arg1: i32) -> (i32, i32, i32, i32) {
    %c0_i32 = arith.constant 0 : i32
    %c0_i32_0 = arith.constant 0 : i32
    %c0_i32_1 = arith.constant 0 : i32
    return %arg0, %arg1, %c0_i32, %c0_i32_0 : i32, i32, i32, i32
  }
  func.func @transform_4(%arg0: i32, %arg1: i32) -> (i32, i32, i32, i32) {
    %c0_i32 = arith.constant 0 : i32
    %c0_i32_0 = arith.constant 0 : i32
    %c0_i32_1 = arith.constant 0 : i32
    return %arg0, %arg1, %c0_i32, %c0_i32_0 : i32, i32, i32, i32
  }
}

module attributes {stable_mosaic.version = 11 : i64} {
  func.func @_bn_add_relu_kernel(%arg0: i32, %arg1: i32, %arg2: memref<1x1x64x4xf32, #tpu.memory_space<vmem>>, %arg3: memref<1x1x64x4xf32, #tpu.memory_space<vmem>>, %arg4: memref<2x4xf32, #tpu.memory_space<vmem>>, %arg5: memref<1x1x64x4xf32, #tpu.memory_space<vmem>>) attributes {dimension_semantics = [#tpu.dimension_semantics<parallel>, #tpu.dimension_semantics<parallel>], iteration_bounds = array<i64: 2, 4>, scalar_prefetch = 0 : i64, scratch_operands = 0 : i64, tpu.core_type = #tpu.core_type<tc>, window_params = [{transform_indices = @transform_0, window_bounds = array<i64: 1, 1, 64, 4>}, {transform_indices = @transform_1, window_bounds = array<i64: 1, 1, 64, 4>}, {pipeline_mode = #tpu.pipeline_mode<synchronous>, transform_indices = @transform_2, window_bounds = array<i64: 2, 4>}, {transform_indices = @transform_3, window_bounds = array<i64: 1, 1, 64, 4>}]} {
    %c0 = arith.constant 0 : index
    %c0_0 = arith.constant 0 : index
    %0 = vector.load %arg4[%c0, %c0_0] : memref<2x4xf32, #tpu.memory_space<vmem>>, vector<1x4xf32>
    %c1 = arith.constant 1 : index
    %c0_1 = arith.constant 0 : index
    %1 = vector.load %arg4[%c1, %c0_1] : memref<2x4xf32, #tpu.memory_space<vmem>>, vector<1x4xf32>
    %c0_2 = arith.constant 0 : index
    %c0_3 = arith.constant 0 : index
    %c0_4 = arith.constant 0 : index
    %c0_5 = arith.constant 0 : index
    %2 = vector.load %arg2[%c0_2, %c0_3, %c0_4, %c0_5] : memref<1x1x64x4xf32, #tpu.memory_space<vmem>>, vector<1x1x64x4xf32>
    %3 = vector.shape_cast %2 : vector<1x1x64x4xf32> to vector<64x4xf32>
    %4 = vector.broadcast %0 : vector<1x4xf32> to vector<64x4xf32>
    %5 = arith.mulf %3, %4 : vector<64x4xf32>
    %6 = vector.broadcast %1 : vector<1x4xf32> to vector<64x4xf32>
    %7 = arith.addf %5, %6 : vector<64x4xf32>
    %c0_6 = arith.constant 0 : index
    %c0_7 = arith.constant 0 : index
    %c0_8 = arith.constant 0 : index
    %c0_9 = arith.constant 0 : index
    %8 = vector.load %arg3[%c0_6, %c0_7, %c0_8, %c0_9] : memref<1x1x64x4xf32, #tpu.memory_space<vmem>>, vector<1x1x64x4xf32>
    %9 = vector.shape_cast %8 : vector<1x1x64x4xf32> to vector<64x4xf32>
    %10 = arith.addf %7, %9 : vector<64x4xf32>
    %cst = arith.constant 0.000000e+00 : f32
    %11 = vector.broadcast %cst : f32 to vector<64x4xf32>
    %12 = arith.maximumf %10, %11 : vector<64x4xf32>
    %c0_10 = arith.constant 0 : index
    %c0_11 = arith.constant 0 : index
    %c0_12 = arith.constant 0 : index
    %c0_13 = arith.constant 0 : index
    %13 = vector.load %arg5[%c0_10, %c0_11, %c0_12, %c0_13] : memref<1x1x64x4xf32, #tpu.memory_space<vmem>>, vector<1x1x64x4xf32>
    %14 = vector.shape_cast %13 : vector<1x1x64x4xf32> to vector<64x4xf32>
    %15 = vector.shape_cast %12 : vector<64x4xf32> to vector<1x1x64x4xf32>
    tpu.vector_store %arg5[%c0_10, %c0_11, %c0_12, %c0_13], %15 {strides = array<i32>} : memref<1x1x64x4xf32, #tpu.memory_space<vmem>>, vector<1x1x64x4xf32>,
    return
  }
  func.func @transform_0(%arg0: i32, %arg1: i32) -> (i32, i32, i32, i32) {
    %c0_i32 = arith.constant 0 : i32
    %c0_i32_0 = arith.constant 0 : i32
    %c0_i32_1 = arith.constant 0 : i32
    return %arg0, %arg1, %c0_i32, %c0_i32_0 : i32, i32, i32, i32
  }
  func.func @transform_1(%arg0: i32, %arg1: i32) -> (i32, i32, i32, i32) {
    %c0_i32 = arith.constant 0 : i32
    %c0_i32_0 = arith.constant 0 : i32
    %c0_i32_1 = arith.constant 0 : i32
    return %arg0, %arg1, %c0_i32, %c0_i32_0 : i32, i32, i32, i32
  }
  func.func @transform_2(%arg0: i32, %arg1: i32) -> (i32, i32) {
    %c0_i32 = arith.constant 0 : i32
    %c0_i32_0 = arith.constant 0 : i32
    %c0_i32_1 = arith.constant 0 : i32
    return %c0_i32, %c0_i32_0 : i32, i32
  }
  func.func @transform_3(%arg0: i32, %arg1: i32) -> (i32, i32, i32, i32) {
    %c0_i32 = arith.constant 0 : i32
    %c0_i32_0 = arith.constant 0 : i32
    %c0_i32_1 = arith.constant 0 : i32
    return %arg0, %arg1, %c0_i32, %c0_i32_0 : i32, i32, i32, i32
  }
}

</mosaic_0001>

<bundles_post_ra>
// kernel: basic_block_forward.5
= control target key start
LH: loop header
LB: loop body
LE: loop exit
PB: predicated region body
PF: predicated region fallthrough
CT: control target
= control target key end

     0   :  { %s542_s12 = smov 0   ;;  %s544_s13 = smov 0   ;;  %s625_s0 = inlined_call_operand.vmem [shape: f32[2,4,64,4], index: 0, kind: input, shape index: {}]   ;;  %s626_s1 = inlined_call_operand.vmem [shape: f32[2,4,64,4], index: 1, kind: input, shape index: {}]   ;;  %s627_s2 = inlined_call_operand.vmem [shape: f32[2,4], index: 2, kind: input, shape index: {}]   ;;  %s628_s3 = inlined_call_operand.vmem [shape: f32[2,4,64,4], index: 3, kind: output, shape index: {}]  }
   0x1   :  { %s546_s14 = smov 0   ;;  %s548_s15 = smov 0  }
   0x2   :  { %s550_s16 = smov 0  }
   0x3 LB: > { %s22_s17 = sadd.s32 1, %s512_s14  ;;  %s25_s18 = sadd.s32 1, %s516_s15  ;;  %s520_s16 = sphi %s550_s16, %s13_s16   ;;  %s516_s15 = sphi %s548_s15, %s632_s15   ;;  %s512_s14 = sphi %s546_s14, %s631_s14   ;;  %s508_s13 = sphi %s544_s13, %s630_s13   ;;  %s504_s12 = sphi %s542_s12, %s629_s12  }
   0x4   : > { %p23_p0 = scmp.ge.s32.totalorder %s22_s17, 4  ;;  %p428_p1 = scmp.ge.s32.totalorder %s520_s16, 1 }
   0x5   : > { %p173_p2 = scmp.lt.s32.totalorder %s520_s16, 9 }
   0x6   : > { %s634_s17 = smov (%p23_p0, %s22_s17), 0  ;;  %s636_s18 = smov (!%p23_p0, %s25_s18), %s516_s15 }
   0x7   : > { %p174_p3 = pnand %p428_p1, %p173_p2  ;;  %p27_p4 = scmp.ge.s32.totalorder %s636_s18, 2 }
   0x8   : > { %p214_p5 = scmp.lt.s32.totalorder (!%p174_p3), %s508_s13, 1  ;;  %p216_p6 = scmp.lt.s32.totalorder (!%p174_p3), %s504_s12, 3  ;;  %v438_v0 = vld [vmem:[%s627_s2] ss:$0 sm:$0xff] (!%p174_p3)  ;;  %v439_v1 = vld [vmem:[%s627_s2 + $0x1] ss:$0 sm:$0xff] (!%p174_p3) }
   0x9   : > { %s638_s18 = smov (%p27_p4, %s636_s18), 0  ;;  %177 = sbr.rel (%p174_p3) target bundleno = 36 (0x24), region = 32 }
   0xa   : > { %vm299_vm0 = vcmask (!%p174_p3), 31744  }
  0x10   : > { %s640_s13 = smov (!%p214_p5, %s508_s13), 1  ;;  %s642_s12 = smov (!%p216_p6, %s504_s12), 3 }
  0x11   : > { %s430_s19 = sshll.u32 %s640_s13, 5  ;;  %s429_s20 = sshll.u32 %s642_s12, 3 }
  0x12   : > { %s220_s21 = sadd.s32 %s430_s19, %s429_s20 }
  0x13   : > { %s572_s22 = sshll.u32 %s220_s21, 3 }
  0x14   : > { %s222_s27 = scalar_lea.vmem %s625_s0, %s572_s22  ;;  %s585_s30 = scalar_lea.vmem %s626_s1, %s572_s22 }
  0x15   : > { %v243_v2 = vld [vmem:[%s222_s27] sm:$0xff]  ;;  %v244_v3 = vld [vmem:[%s222_s27 + $0x8] sm:$0xff]  ;;  %v245_v7 = vld [vmem:[%s222_s27 + $0x10] sm:$0xff]  ;;  %s240_s8 = scalar_lea.vmem %s628_s3, %s572_s22 }
  0x16   : > { %v255_v4 = vmul.f32 %v438_v0, %v243_v2  ;;  %v275_v5 = vld [vmem:[%s585_s30] sm:$0xff]  ;;  %v256_v6 = vmul.f32 %v438_v0, %v244_v3  ;;  %v276_v8 = vld [vmem:[%s585_s30 + $0x8] sm:$0xff]  ;;  %v257_v9 = vmul.f32 %v438_v0, %v245_v7  ;;  %v246_v10 = vld [vmem:[%s222_s27 + $0x18] sm:$0xff] }
  0x17   : > { %v247_v11 = vld [vmem:[%s222_s27 + $0x20] sm:$0xff]  ;;  %v277_v14 = vld [vmem:[%s585_s30 + $0x10] sm:$0xff]  ;;  %v258_v15 = vmul.f32 %v438_v0, %v246_v10  ;;  %v278_v16 = vld [vmem:[%s585_s30 + $0x18] sm:$0xff] }
  0x18   : > { %v267_v12 = vadd.f32 %v439_v1, %v255_v4  ;;  %v268_v13 = vadd.f32 %v439_v1, %v256_v6  ;;  %v259_v17 = vmul.f32 %v438_v0, %v247_v11  ;;  %v248_v18 = vld [vmem:[%s222_s27 + $0x28] sm:$0xff]  ;;  %v269_v19 = vadd.f32 %v439_v1, %v257_v9  ;;  %v279_v20 = vld [vmem:[%s585_s30 + $0x20] sm:$0xff]  ;;  %v249_v22 = vld [vmem:[%s222_s27 + $0x30] sm:$0xff] }
  0x19   : > { %v260_v21 = vmul.f32 %v438_v0, %v248_v18  ;;  %v250_v23 = vld [vmem:[%s222_s27 + $0x38] sm:$0xff]  ;;  %v270_v26 = vadd.f32 %v439_v1, %v258_v15  ;;  %v280_v28 = vld [vmem:[%s585_s30 + $0x28] sm:$0xff]  ;;  %v261_v31 = vmul.f32 %v438_v0, %v249_v22  ;;  %v281_v37 = vld [vmem:[%s585_s30 + $0x30] sm:$0xff] }
  0x1a   : > { %v283_v24 = vadd.f32 %v275_v5, %v267_v12  ;;  %v284_v25 = vadd.f32 %v276_v8, %v268_v13  ;;  %v271_v27 = vadd.f32 %v439_v1, %v259_v17  ;;  %v285_v29 = vadd.f32 %v277_v14, %v269_v19  ;;  %v282_v38 = vld [vmem:[%s585_s30 + $0x38] sm:$0xff] }
  0x1b   : > { %v272_v30 = vadd.f32 %v439_v1, %v260_v21  ;;  %v262_v32 = vmul.f32 %v438_v0, %v250_v23  ;;  %v286_v35 = vadd.f32 %v278_v16, %v270_v26  ;;  %v273_v41 = vadd.f32 %v439_v1, %v261_v31 }
  0x1c   : > { %v291_v33 = vmax.f32 %v283_v24, 0.0  ;;  %v292_v34 = vmax.f32 %v284_v25, 0.0  ;;  %v287_v36 = vadd.f32 %v279_v20, %v271_v27  ;;  %v293_v39 = vmax.f32 %v285_v29, 0.0 }
  0x1d   : > { %v288_v40 = vadd.f32 %v280_v28, %v272_v30  ;;  %v274_v42 = vadd.f32 %v439_v1, %v262_v32  ;;  %v294_v43 = vmax.f32 %v286_v35, 0.0  ;;  %v289_v46 = vadd.f32 %v281_v37, %v273_v41 }
  0x1e   : > { %300 = vst.msk [vmem:[%s240_s8] sm:$0xff] %vm299_vm0, %v291_v33  ;;  %301 = vst.msk [vmem:[%s240_s8 + $0x8] sm:$0xff] %vm299_vm0, %v292_v34  ;;  %v295_v44 = vmax.f32 %v287_v36, 0.0 }
  0x1f   : > { %302 = vst.msk [vmem:[%s240_s8 + $0x10] sm:$0xff] %vm299_vm0, %v293_v39  ;;  %v296_v45 = vmax.f32 %v288_v40, 0.0  ;;  %v290_v47 = vadd.f32 %v282_v38, %v274_v42  ;;  %303 = vst.msk [vmem:[%s240_s8 + $0x18] sm:$0xff] %vm299_vm0, %v294_v43  ;;  %v297_v48 = vmax.f32 %v289_v46, 0.0 }
  0x20   : > { %304 = vst.msk [vmem:[%s240_s8 + $0x20] sm:$0xff] %vm299_vm0, %v295_v44 }
  0x21   : > { %305 = vst.msk [vmem:[%s240_s8 + $0x28] sm:$0xff] %vm299_vm0, %v296_v45  ;;  %v298_v49 = vmax.f32 %v290_v47, 0.0  ;;  %306 = vst.msk [vmem:[%s240_s8 + $0x30] sm:$0xff] %vm299_vm0, %v297_v48 }
  0x23   : > { %307 = vst.msk [vmem:[%s240_s8 + $0x38] sm:$0xff] %vm299_vm0, %v298_v49 }
  0x24 PF: > { %s13_s16 = sadd.s32 1, %s520_s16   ;;  %s629_s12 = smov %s512_s14 }
  0x25   : > { %p10_p7 = scmp.ge.s32.totalorder %s13_s16, 10   ;;  %s630_s13 = smov %s516_s15 }
  0x26   : > { %s631_s14 = smov %s634_s17  ;;  %s632_s15 = smov %s638_s18 }
  0x27   :  { %12 = sbr.rel (!%p10_p7) target bundleno = 3 (0x3), region = 65 }

// kernel: basic_block_forward.3
= control target key start
LH: loop header
LB: loop body
LE: loop exit
PB: predicated region body
PF: predicated region fallthrough
CT: control target
= control target key end

     0   :  { %s1986_s12 = smov 0   ;;  %s1988_s13 = smov 0   ;;  %s2431_s0 = inlined_call_operand.vmem [shape: bf16[2,6,10,10,4], index: 0, kind: input, shape index: {}]   ;;  %s2432_s1 = inlined_call_operand.vmem [shape: bf16[3,9,4,4], index: 1, kind: input, shape index: {}]   ;;  %s2433_s2 = inlined_call_operand.vmem [shape: f32[2,4,64,4], index: 2, kind: output, shape index: {0}]   ;;  %s2434_s3 = inlined_call_operand.vmem [shape: f32[2,4,2,4], index: 3, kind: output, shape index: {1}]  }
   0x1   :  { %s1990_s14 = smov 0   ;;  %s1992_s15 = smov 0  }
   0x2   :  { %s1994_s16 = smov 0   ;;  %s1996_s17 = smov 0  }
   0x3   :  { %s1998_s18 = smov 0  }
   0x4 LB: > { %s26_s19 = sadd.s32 1, %s1951_s15  ;;  %s29_s20 = sadd.s32 1, %s1955_s16  ;;  %s1963_s18 = sphi %s1998_s18, %s14_s18   ;;  %s1959_s17 = sphi %s1996_s17, %s2444_s17   ;;  %s1955_s16 = sphi %s1994_s16, %s2443_s16   ;;  %s1951_s15 = sphi %s1992_s15, %s2442_s15   ;;  %s1947_s14 = sphi %s1990_s14, %s2441_s14   ;;  %s1943_s13 = sphi %s1988_s13, %s2440_s13   ;;  %s1939_s12 = sphi %s1986_s12, %s2439_s12  }
   0x5   : > { %p27_p0 = scmp.ge.s32.totalorder %s26_s19, 3  ;;  %p1544_p1 = scmp.ge.s32.totalorder %s1963_s18, 1 }
   0x6   : > { %p173_p2 = scmp.lt.s32.totalorder %s1963_s18, 25  ;;  %s33_s21 = sadd.s32 1, %s1959_s17 }
   0x7   : > { %s2446_s19 = smov (%p27_p0, %s26_s19), 0  ;;  %s2448_s20 = smov (!%p27_p0, %s29_s20), %s1955_s16 }
   0x8   : > { %p174_p3 = pnand %p1544_p1, %p173_p2  ;;  %p31_p4 = scmp.ge.s32.totalorder %s2448_s20, 4 }
   0x9   : > { %s1629_s22 = smul.u32 (!%p174_p3), 18, %s1939_s12  ;;  %s214_s23 = sadd.s32 (!%p174_p3), %s1939_s12, %s1943_s13  ;;  %vm415_vm0 = vcmask (!%p174_p3), 1041408   ;;  %vm275_vm1 = vsmask.f32 (!%p174_p3), 3328  ;;  %vm276_vm2 = vsmask.f32 (!%p174_p3), 7440 }
   0xa   : > { %s2450_s20 = smov (%p31_p4, %s2448_s20), 0  ;;  %s2452_s21 = smov (!%p31_p4, %s33_s21), %s1959_s17 }
   0xb   : > { %p35_p5 = scmp.ge.s32.totalorder %s2452_s21, 2  ;;  %177 = sbr.rel (%p174_p3) target bundleno = 371 (0x173), region = 28  ;;  %vm402_vm3 = vcmask (!%p174_p3), 31744   ;;  %vm2120_vm4 = vmor (!%p174_p3), %vm275_vm1, %vm276_vm2  ;;  %vm592_vm5 = vcmask (!%p174_p3), 1042432   ;;  %vm593_vm6 = vcmask (!%p174_p3), 1046532  }
   0xc   : > { %p215_p6 = scmp.lt.s32.totalorder (!%p174_p3), %s1947_s14, 1  ;;  %p217_p7 = scmp.lt.s32.totalorder (!%p174_p3), %s214_s23, 5  ;;  %vm2186_vm7 = vmor (!%p174_p3), %vm592_vm5, %vm593_vm6 }
   0xd   : > { %s2454_s21 = smov (%p35_p5, %s2452_s21), 0  ;;  %s2038_s26 = scalar_lea.vmem (!%p174_p3), %s2432_s1, %s1629_s22 }
   0xe   : > { %p227_p8 = scmp.lt.s32.totalorder (!%p174_p3), %s1943_s13, 3  ;;  %v267_v0 = vld [vmem:[%s2038_s26 + $0x2] sm:$0x3] (!%p174_p3)  ;;  %v2043_v1 = vld [vmem:[%s2038_s26 + $0x8] sm:$0x3] (!%p174_p3)  ;;  %p1625_p9 = scmp.ne.s32.totalorder (!%p174_p3), %s1939_s12, 0 }
   0xf   : > { %1831 = vmatprep.subr.msk.bf16.mxu1 (!%p174_p3), %vm415_vm0, %v267_v0  ;;  %1835 = vmatprep.subr.msk.bf16.mxu0 (!%p174_p3), %vm415_vm0, %v2043_v1  ;;  %v417_v2 = vsel (!%p174_p3), %vm415_vm0, %v267_v0, 0  ;;  %v2051_v3 = vsel (!%p174_p3), %vm415_vm0, %v2043_v1, 0  ;;  %v266_v4 = vld [vmem:[%s2038_s26] sm:$0x3] (!%p174_p3)  ;;  %v271_v5 = vld [vmem:[%s2038_s26 + $0xa] sm:$0x3] (!%p174_p3) }
  0x10   : > { %1676 = vmatpush3.bf16.msra.mxu1 (!%p174_p3), %v417_v2  ;;  %1716 = vmatpush3.bf16.msra.mxu0 (!%p174_p3), %v2051_v3  ;;  %v2104_v23 = vsel (!%p174_p3), %vm415_vm0, %v266_v4, 0  ;;  %v2111_v28 = vsel (!%p174_p3), %vm415_vm0, %v271_v5, 0 }
  0x11   : > { %1832 = vmatprep.subr.msk.bf16.mxu1 (!%p174_p3), %vm415_vm0, %v266_v4  ;;  %1837 = vmatprep.subr.msk.bf16.mxu0 (!%p174_p3), %vm415_vm0, %v271_v5 }
  0x12   : > { %s2456_s14 = smov (!%p215_p6, %s1947_s14), 1  ;;  %s2458_s23 = smov (!%p217_p7, %s214_s23), 5 }
  0x13   : > { %s1842_s27 = smul.u32 120, %s2456_s14  ;;  %s1547_s29 = sshll.u32 %s2456_s14, 5 }
  0x14   : > { %s1841_s28 = smul.u32 20, %s2458_s23  ;;  %s2460_s13 = smov (!%p227_p8, %s1943_s13), 3 }
  0x15   : > { %s1549_s4 = sshll.u32 %s2456_s14, 2  ;;  %s1546_s6 = sshll.u32 %s2460_s13, 3 }
  0x16   : > { %s221_s30 = sadd.s32 %s1842_s27, %s1841_s28  ;;  %s231_s10 = sadd.s32 %s1547_s29, %s1546_s6 }
  0x17   : > { %s1545_s5 = sshll.u32 %s221_s30, 2  ;;  %s1548_s11 = sshll.u32 %s231_s10, 3 }
  0x18   : > { %s2064_s9 = scalar_lea.vmem %s2431_s0, %s1545_s5  ;;  %s239_s22 = sadd.s32 %s1549_s4, %s2460_s13 }
  0x19   : > { %v2067_v6 = vld [vmem:[%s2064_s9] sm:$0xf]  ;;  %v2070_v7 = vld [vmem:[%s2064_s9 + $0x4] sm:$0x1]  ;;  %s2075_s24 = scalar_lea.vmem %s2433_s2, %s1548_s11  ;;  %s1550_s25 = sshll.u32 %s239_s22, 1 }
  0x1a   : > { %v2078_v8 = vld [vmem:[%s2064_s9 + $0x8] sm:$0xf]  ;;  %v2081_v9 = vld [vmem:[%s2064_s9 + $0xc] sm:$0x1]  ;;  %v279_v10 = vshrl.u32 %v2067_v6, 16  ;;  %s2087_s28 = scalar_lea.vmem %s2434_s3, %s1550_s25  ;;  %v282_v11 = vshll.u32 %v2067_v6, 16 }
  0x1b   : > { %v288_v12 = vshll.u32 %v2070_v7, 16  ;;  %v293_v13 = vshrl.u32 %v2078_v8, 16  ;;  %v296_v14 = vshll.u32 %v2078_v8, 16  ;;  %v2094_v15 = vld [vmem:[%s2064_s9 + $0x10] sm:$0xf]  ;;  %v302_v17 = vshll.u32 %v2081_v9, 16 }
  0x1c   : > { %v281_v16 = vrot.slane %v279_v10, 4  ;;  %v2098_v18 = vld [vmem:[%s2064_s9 + $0x14] sm:$0x1]  ;;  %v284_v19 = vrot.slane %v282_v11, 5  ;;  %v2101_v22 = vld [vmem:[%s2064_s9 + $0x18] sm:$0xf] }
  0x1d   : > { %v295_v20 = vrot.slane %v293_v13, 4  ;;  %v298_v21 = vrot.slane %v296_v14, 5  ;;  %v290_v24 = vrot.slane %v288_v12, 5  ;;  %v304_v25 = vrot.slane %v302_v17, 5  ;;  %v2107_v26 = vld [vmem:[%s2064_s9 + $0x1c] sm:$0x1] }
  0x1e   : > { %v307_v27 = vshrl.u32 %v2094_v15, 16  ;;  %v285_v29 = vor.u32 %v284_v19, %v281_v16  ;;  %v2114_v31 = vld [vmem:[%s2064_s9 + $0x20] sm:$0xf]  ;;  %v310_v32 = vshll.u32 %v2094_v15, 16  ;;  %v316_v33 = vshll.u32 %v2098_v18, 16 }
  0x1f   : > { %v299_v30 = vor.u32 %v298_v21, %v295_v20  ;;  %v321_v36 = vshrl.u32 %v2101_v22, 16  ;;  %v324_v37 = vshll.u32 %v2101_v22, 16  ;;  %v330_v38 = vshll.u32 %v2107_v26, 16  ;;  %v2128_v41 = vld [vmem:[%s2064_s9 + $0x24] sm:$0x1] }
  0x20   : > { %v309_v35 = vrot.slane %v307_v27, 4  ;;  %v286_v39 = vrot.slane %v285_v29, 4  ;;  %v312_v42 = vrot.slane %v310_v32, 5  ;;  %v318_v43 = vrot.slane %v316_v33, 5  ;;  %v2137_v52 = vld [vmem:[%s2064_s9 + $0x28] sm:$0xf] }
  0x21   : > { %v300_v40 = vrot.slane %v299_v30, 4  ;;  %v323_v44 = vrot.slane %v321_v36, 4  ;;  %v326_v45 = vrot.slane %v324_v37, 5  ;;  %v332_v46 = vrot.slane %v330_v38, 5  ;;  %v2141_v57 = vld [vmem:[%s2064_s9 + $0x2c] sm:$0x1] }
  0x22   : > { %v335_v47 = vshrl.u32 %v2114_v31, 16  ;;  %v291_v48 = vsel %vm2120_vm4, %v286_v39, %v290_v24  ;;  %v313_v50 = vor.u32 %v312_v42, %v309_v35  ;;  %v338_v51 = vshll.u32 %v2114_v31, 16  ;;  %v2146_v62 = vld [vmem:[%s2064_s9 + $0x30] sm:$0xf]  ;;  %v2156_v12 = vld [vmem:[%s2064_s9 + $0x34] sm:$0x1] }
  0x23   : > { %v305_v49 = vsel %vm2120_vm4, %v300_v40, %v304_v25  ;;  %v327_v54 = vor.u32 %v326_v45, %v323_v44  ;;  %v344_v56 = vshll.u32 %v2128_v41, 16  ;;  %v601_v58 = vrot.slane %v2081_v9, 5  ;;  %v2159_v13 = vld [vmem:[%s2064_s9 + $0x38] sm:$0xf]  ;;  %v2174_v33 = vld [vmem:[%s2038_s26 + $0x4] sm:$0x3] }
  0x24   : > { %v1552_v53 = vcombine.low %v291_v48, %v305_v49  ;;  %v337_v55 = vrot.slane %v335_v47, 4  ;;  %v314_v59 = vrot.slane %v313_v50, 4  ;;  %v340_v60 = vrot.slane %v338_v51, 5 }
  0x25   : > { %v605_v61 = vrot.slane %v2098_v18, 5  ;;  %v328_v63 = vrot.slane %v327_v54, 4  ;;  %v346_v0 = vrot.slane %v344_v56, 5  ;;  %v609_v2 = vrot.slane %v2107_v26, 5  ;;  %v2164_v18 = vld [vmem:[%s2064_s9 + $0x3c] sm:$0x1] }
  0x26   : > { %1677 = vmatprep.mubr.msk.bf16.mxu1 %vm402_vm3, %v1552_v53  ;;  %v349_v4 = vshrl.u32 %v2137_v52, 16  ;;  %v319_v5 = vsel %vm2120_vm4, %v314_v59, %v318_v43  ;;  %v341_v10 = vor.u32 %v340_v60, %v337_v55  ;;  %v352_v9 = vshll.u32 %v2137_v52, 16  ;;  %v2244_v26 = vld [vmem:[%s2064_s9 + $0x44] sm:$0x1] }
  0x27   : > { %v358_v11 = vshll.u32 %v2141_v57, 16  ;;  %v333_v14 = vsel %vm2120_vm4, %v328_v63, %v332_v46  ;;  %v1592_v16 = vcombine.low %v305_v49, %v319_v5  ;;  %v363_v19 = vshrl.u32 %v2146_v62, 16  ;;  %v272_v49 = vld [vmem:[%s2038_s26 + $0xc] sm:$0x3] }
  0x28   : > { %v351_v17 = vrot.slane %v349_v4, 4  ;;  %v342_v20 = vrot.slane %v341_v10, 4  ;;  %v2167_v21 = vcombine.low %v319_v5, %v333_v14  ;;  %v354_v24 = vrot.slane %v352_v9, 5 }
  0x29   : > { %v360_v25 = vrot.slane %v358_v11, 5  ;;  %1717 = vmatprep.mubr.msk.bf16.mxu0 %vm402_vm3, %v1592_v16  ;;  %v365_v27 = vrot.slane %v363_v19, 4  ;;  %v366_v29 = vshll.u32 %v2146_v62, 16  ;;  %v372_v30 = vshll.u32 %v2156_v12, 16  ;;  %v2241_v19 = vld [vmem:[%s2064_s9 + $0x40] sm:$0xf] }
  0x2a   : > { %v377_v32 = vshrl.u32 %v2159_v13, 16  ;;  %v347_v35 = vsel %vm2120_vm4, %v342_v20, %v346_v0  ;;  %1678 = vmatmul.mubr.msk.bf16.vlgmr.msra.gmra.mrb[0].mxu1 %vm402_vm3, %v2167_v21  ;;  %v355_v36 = vor.u32 %v354_v24, %v351_v17  ;;  %v380_v37 = vshll.u32 %v2159_v13, 16 }
  0x2b   : > { %v386_v38 = vshll.u32 %v2164_v18, 16  ;;  %v613_v39 = vrot.slane %v2128_v41, 5  ;;  %v1593_v40 = vcombine.low %v333_v14, %v347_v35  ;;  %1686 = vmatpush3.bf16.msra.mxu1 %v2104_v23  ;;  %v368_v42 = vrot.slane %v366_v29, 5 }
  0x2c   : > { %v379_v43 = vrot.slane %v377_v32, 4  ;;  %v356_v45 = vrot.slane %v355_v36, 4  ;;  %v374_v46 = vrot.slane %v372_v30, 5  ;;  %v382_v47 = vrot.slane %v380_v37, 5  ;;  %1833 = vmatprep.subr.msk.bf16.mxu1 %vm415_vm0, %v2174_v33  ;;  %v273_v32 = vld [vmem:[%s2038_s26 + $0xe] sm:$0x3] }
  0x2d   : > { %v1569_v48 = vrot.slane %v2078_v8, 9  ;;  %1718 = vmatmul.mubr.msk.bf16.vlgmr.msra.gmra.mrb[0].mxu0 %vm402_vm3, %v1593_v40  ;;  %v369_v23 = vor.u32 %v368_v42, %v365_v27  ;;  %v388_v41 = vrot.slane %v386_v38, 5  ;;  %v1570_v50 = vrot.slane %v2094_v15, 9  ;;  %v269_v42 = vld [vmem:[%s2038_s26 + $0x6] sm:$0x3] }
  0x2e   : > { %v1571_v51 = vrot.slane %v2101_v22, 9  ;;  %1726 = vmatpush3.bf16.msra.mxu0 %v2111_v28  ;;  %v2200_v53 = vsel %vm2120_vm4, %v356_v45, %v360_v25  ;;  %v383_v54 = vor.u32 %v382_v47, %v379_v43  ;;  %v1572_v56 = vrot.slane %v2114_v31, 9  ;;  %v274_v47 = vld [vmem:[%s2038_s26 + $0x10] sm:$0x3] }
  0x2f   : > { %v602_v55 = vsel %vm2186_vm7, %v1569_v48, %v601_v58  ;;  %v2206_v59 = vcombine.low %v347_v35, %v2200_v53  ;;  %v370_v60 = vrot.slane %v369_v23, 4  ;;  %v606_v63 = vsel %vm2186_vm7, %v1570_v50, %v605_v61  ;;  %1838 = vmatprep.subr.msk.bf16.mxu0 %vm415_vm0, %v272_v49 }
  0x30   : > { %v1573_v28 = vrot.slane %v2137_v52, 9  ;;  %v384_v0 = vrot.slane %v383_v54, 4  ;;  %v1601_v4 = vcombine.low %v602_v55, %v606_v63  ;;  %v1560_v5 = vcombine.low %v2067_v6, %v2078_v8 }
  0x31   : > { %1681 = vmatprep.mubr.msk.bf16.mxu1 %vm402_vm3, %v2206_v59  ;;  %v2216_v58 = vsel %vm2120_vm4, %v370_v60, %v374_v46  ;;  %v617_v61 = vrot.slane %v2141_v57, 5  ;;  %v1574_v10 = vrot.slane %v2146_v62, 9  ;;  %v610_v11 = vsel %vm2186_vm7, %v1571_v51, %v609_v2  ;;  %v261_v46 = vld [vmem:[%s2064_s9 + $0x48] sm:$0xf] }
  0x32   : > { %v2224_v9 = vsel %vm2120_vm4, %v384_v0, %v388_v41  ;;  %v614_v14 = vsel %vm2186_vm7, %v1572_v56, %v613_v39  ;;  %1727 = vmatprep.mubr.msk.bf16.mxu0 %vm402_vm3, %v1601_v4  ;;  %v621_v16 = vrot.slane %v2156_v12, 5  ;;  %v1575_v12 = vrot.slane %v2159_v13, 9  ;;  %v262_v0 = vld [vmem:[%s2064_s9 + $0x4c] sm:$0x1] }
  0x33   : > { %v2236_v57 = vcombine.low %v2216_v58, %v2224_v9  ;;  %v618_v17 = vsel %vm2186_vm7, %v1573_v28, %v617_v61  ;;  %v1602_v20 = vcombine.low %v610_v11, %v614_v14  ;;  %v625_v25 = vrot.slane %v2164_v18, 5 }
  0x34   : > { %v622_v2 = vsel %vm2186_vm7, %v1574_v10, %v621_v16  ;;  %v1600_v27 = vrot.slane %v2241_v19, 9  ;;  %v931_v29 = vrot.slane %v2244_v26, 5  ;;  %v1033_v30 = vsel %vm415_vm0, %v272_v49, 0 }
  0x35   : > { %1682 = vmatmul.mubr.msk.bf16.gmra.mrb[4].mxu1 %vm402_vm3, %v2236_v57  ;;  %v1603_v24 = vcombine.low %v618_v17, %v622_v2  ;;  %v1561_v35 = vcombine.low %v2094_v15, %v2101_v22  ;;  %v626_v36 = vsel %vm2186_vm7, %v1575_v12, %v625_v25  ;;  %v1562_v37 = vcombine.low %v2114_v31, %v2137_v52 }
  0x36   : > { %1687 = vmatprep.mubr.msk.bf16.mxu1 %vm402_vm3, %v1560_v5  ;;  %v2265_v18 = vsel %vm2186_vm7, %v1600_v27, %v931_v29  ;;  %v597_v38 = vrot.slane %v2070_v7, 5  ;;  %v652_v39 = vsel %vm415_vm0, %v2174_v33, 0  ;;  %v1568_v40 = vrot.slane %v2067_v6, 9 }
  0x37   : > { %v1604_v43 = vcombine.low %v626_v36, %v2265_v18  ;;  %v1563_v33 = vcombine.low %v2146_v62, %v2159_v13  ;;  %v1128_v45 = vsel %vm415_vm0, %v273_v32, 0  ;;  %v1577_v48 = vcombine.low %v606_v63, %v610_v11 }
  0x38   : > { %v598_v7 = vsel %vm2186_vm7, %v1568_v40, %v597_v38  ;;  %v1109_v49 = vshrl.u32 %v261_v46, 16  ;;  %v1112_v23 = vshll.u32 %v261_v46, 16  ;;  %v1578_v41 = vcombine.low %v614_v14, %v618_v17 }
  0x39   : > { %1728 = vmatmul.mubr.msk.bf16.vlgmr.msra.gmra.mrb[0].mxu0 %vm402_vm3, %v1602_v20  ;;  %v1576_v6 = vcombine.low %v598_v7, %v602_v55  ;;  %v822_v50 = vshrl.u32 %v2241_v19, 16  ;;  %v825_v51 = vshll.u32 %v2241_v19, 16  ;;  %v746_v54 = vsel %vm415_vm0, %v269_v42, 0 }
  0x3a   : > { %1736 = vmatpush3.bf16.msra.mxu0 %v1033_v30  ;;  %1731 = vmatprep.mubr.msk.bf16.mxu0 %vm402_vm3, %v1603_v24  ;;  %v1609_v55 = vcombine.low %v2241_v19, %v261_v46  ;;  %v1111_v63 = vrot.slane %v1109_v49, 4  ;;  %v1114_v28 = vrot.slane %v1112_v23, 5  ;;  %v1579_v4 = vcombine.low %v622_v2, %v626_v36 }
  0x3b   : > { %1839 = vmatprep.subr.msk.bf16.mxu0 %vm415_vm0, %v273_v32  ;;  %v824_v56 = vrot.slane %v822_v50, 4  ;;  %v827_v60 = vrot.slane %v825_v51, 5  ;;  %v1584_v5 = vcombine.low %v2078_v8, %v2094_v15  ;;  %v831_v10 = vshll.u32 %v2244_v26, 16 }
  0x3c   : > { %v1115_v11 = vor.u32 %v1114_v28, %v1111_v63  ;;  %v1118_v14 = vshll.u32 %v262_v0, 16  ;;  %v1214_v2 = vsel %vm415_vm0, %v274_v47, 0  ;;  %v1585_v8 = vcombine.low %v2101_v22, %v2114_v31 }
  0x3d   : > { %1688 = vmatmul.mubr.msk.bf16.vlgmr.msra.gmra.mrb[0].mxu1 %vm402_vm3, %v1561_v35  ;;  %v828_v61 = vor.u32 %v827_v60, %v824_v56  ;;  %v833_v16 = vrot.slane %v831_v10, 5  ;;  %v1586_v26 = vcombine.low %v2137_v52, %v2146_v62  ;;  %v1587_v22 = vcombine.low %v2159_v13, %v2241_v19 }
  0x3e   : > { %1696 = vmatpush3.bf16.msra.mxu1 %v652_v39  ;;  %1691 = vmatprep.mubr.msk.bf16.mxu1 %vm402_vm3, %v1562_v37  ;;  %v1116_v17 = vrot.slane %v1115_v11, 4  ;;  %v1120_v20 = vrot.slane %v1118_v14, 5  ;;  %v1594_v31 = vcombine.low %v2200_v53, %v2216_v58  ;;  %v1619_v34 = vrot.slane %v261_v46, 9 }
  0x3f   : > { %1834 = vmatprep.subr.msk.bf16.mxu1 %vm415_vm0, %v269_v42  ;;  %v1206_v52 = vrot.slane %v262_v0, 5 }
  0x41   : > { %1732 = vmatmul.mubr.msk.bf16.gmra.mrb[4].mxu0 %vm402_vm3, %v1604_v43 }
  0x42   : > { %1737 = vmatprep.mubr.msk.bf16.mxu0 %vm402_vm3, %v1561_v35 }
  0x45   : > { %1692 = vmatmul.mubr.msk.bf16.gmra.mrb[4].mxu1 %vm402_vm3, %v1563_v33 }
  0x46   : > { %1697 = vmatprep.mubr.msk.bf16.mxu1 %vm402_vm3, %v1576_v6  ;;  %v1965_v6 = vmov (!%p1625_p9), 0.0  }
  0x47   : > { %1293 = vst.msk [vmem:[%s2075_s24] sm:$0xff] (!%p1625_p9), %vm402_vm3, %v1965_v6  ;;  %1294 = vst.msk [vmem:[%s2075_s24 + $0x8] sm:$0xff] (!%p1625_p9), %vm402_vm3, %v1965_v6 }
  0x48   : > { %1295 = vst.msk [vmem:[%s2075_s24 + $0x10] sm:$0xff] (!%p1625_p9), %vm402_vm3, %v1965_v6  ;;  %1296 = vst.msk [vmem:[%s2075_s24 + $0x18] sm:$0xff] (!%p1625_p9), %vm402_vm3, %v1965_v6 }
  0x49   : > { %1738 = vmatmul.mubr.msk.bf16.vlgmr.msra.gmra.mrb[0].mxu0 %vm402_vm3, %v1562_v37  ;;  %1297 = vst.msk [vmem:[%s2075_s24 + $0x20] sm:$0xff] (!%p1625_p9), %vm402_vm3, %v1965_v6  ;;  %1298 = vst.msk [vmem:[%s2075_s24 + $0x28] sm:$0xff] (!%p1625_p9), %vm402_vm3, %v1965_v6 }
  0x4a   : > { %1746 = vmatpush3.bf16.msra.mxu0 %v1128_v45  ;;  %1741 = vmatprep.mubr.msk.bf16.mxu0 %vm402_vm3, %v1563_v33  ;;  %1299 = vst.msk [vmem:[%s2075_s24 + $0x30] sm:$0xff] (!%p1625_p9), %vm402_vm3, %v1965_v6  ;;  %1300 = vst.msk [vmem:[%s2075_s24 + $0x38] sm:$0xff] (!%p1625_p9), %vm402_vm3, %v1965_v6 }
  0x4b   : > { %1840 = vmatprep.subr.msk.bf16.mxu0 %vm415_vm0, %v274_v47 }
  0x4d   : > { %1698 = vmatmul.mubr.msk.bf16.vlgmr.msra.gmra.mrb[0].mxu1 %vm402_vm3, %v1577_v48 }
  0x4e   : > { %1706 = vmatpush3.bf16.msra.mxu1 %v746_v54  ;;  %1701 = vmatprep.mubr.msk.bf16.mxu1 %vm402_vm3, %v1578_v41 }
  0x4f   : > { %1836 = vmatprep.subr.msk.bf16.mxu1 %vm415_vm0, %v2043_v1  ;;  %v829_v1 = vrot.slane %v828_v61, 4 }
  0x51   : > { %1742 = vmatmul.mubr.msk.bf16.gmra.mrb[4].mxu0 %vm402_vm3, %v1609_v55  ;;  %v834_v15 = vsel %vm2120_vm4, %v829_v1, %v833_v16 }
  0x52   : > { %1747 = vmatprep.mubr.msk.bf16.mxu0 %vm402_vm3, %v2167_v21  ;;  %v1121_v21 = vsel %vm2120_vm4, %v1116_v17, %v1120_v20  ;;  %v1595_v62 = vcombine.low %v2224_v9, %v834_v15 }
  0x53   : > { %v1614_v12 = vcombine.low %v834_v15, %v1121_v21 }
  0x55   : > { %1702 = vmatmul.mubr.msk.bf16.gmra.mrb[4].mxu1 %vm402_vm3, %v1579_v4 }
  0x56   : > { %1707 = vmatprep.mubr.msk.bf16.mxu1 %vm402_vm3, %v1584_v5 }
  0x59   : > { %1748 = vmatmul.mubr.msk.bf16.vlgmr.msra.gmra.mrb[0].mxu0 %vm402_vm3, %v2206_v59 }
  0x5a   : > { %1756 = vmatpush3.bf16.msra.mxu0 %v1214_v2  ;;  %1751 = vmatprep.mubr.msk.bf16.mxu0 %vm402_vm3, %v2236_v57 }
  0x5d   : > { %1708 = vmatmul.mubr.msk.bf16.vlgmr.msra.gmra.mrb[0].mxu1 %vm402_vm3, %v1585_v8 }
  0x5e   : > { %1766 = vmatpush3.bf16.msra.mxu1 %v2051_v3  ;;  %1711 = vmatprep.mubr.msk.bf16.mxu1 %vm402_vm3, %v1586_v26  ;;  %v1207_v3 = vsel %vm2186_vm7, %v1619_v34, %v1206_v52 }
  0x5f   : > { %v1620_v13 = vcombine.low %v2265_v18, %v1207_v3 }
  0x61   : > { %1752 = vmatmul.mubr.msk.bf16.gmra.mrb[4].mxu0 %vm402_vm3, %v1614_v12 }
  0x62   : > { %1757 = vmatprep.mubr.msk.bf16.mxu0 %vm402_vm3, %v1577_v48 }
  0x65   : > { %1712 = vmatmul.mubr.msk.bf16.gmra.mrb[4].mxu1 %vm402_vm3, %v1587_v22 }
  0x66   : > { %1721 = vmatprep.mubr.msk.bf16.mxu1 %vm402_vm3, %v1594_v31 }
  0x69   : > { %1758 = vmatmul.mubr.msk.bf16.vlgmr.msra.gmra.mrb[0].mxu0 %vm402_vm3, %v1578_v41 }
  0x6a   : > { %1761 = vmatprep.mubr.msk.bf16.mxu0 %vm402_vm3, %v1579_v4 }
  0x71   : > { %1722 = vmatmul.mubr.msk.bf16.vlgmr.msra.gmra.mrb[4].mxu1 %vm402_vm3, %v1595_v62  ;;  %1762 = vmatmul.mubr.msk.bf16.gmra.mrb[4].mxu0 %vm402_vm3, %v1620_v13 }
 0x130   : > { %v1709_v53 = vpop.f32.mrb[0].mxu1 }
 0x131   : > { %v782_v59 = vpop.f32.mrb[1].mxu1 }
 0x132   : > { %v1710_v58 = vpop.f32.mrb[2].mxu1 }
 0x133   : > { %v785_v57 = vpop.f32.mrb[3].mxu1 }
 0x13c   : > { %v1759_v19 = vpop.f32.mrb[0].mxu0 }
 0x13d   : > { %v1767_v24 = vadd.f32 %v1759_v19, %v1709_v53  ;;  %v1250_v25 = vpop.f32.mrb[1].mxu0 }
 0x13e   : > { %v1768_v27 = vadd.f32 %v1250_v25, %v782_v59  ;;  %v1760_v29 = vpop.f32.mrb[2].mxu0 }
 0x13f   : > { %v1769_v30 = vadd.f32 %v1760_v29, %v1710_v58  ;;  %v1253_v44 = vpop.f32.mrb[3].mxu0 }
 0x140   : > { %v1770_v32 = vadd.f32 %v1253_v44, %v785_v57 }
 0x142   : > { %1292 = sbr.rel (%p1625_p9) target bundleno = 329 (0x149), region = 32 }
 0x144   : > { %v1723_v35 = vpop.f32.mrb[4].mxu1  ;;  %v1763_v9 = vpop.f32.mrb[4].mxu0 }
 0x145   : > { %v1771_v36 = vadd.f32 %v1763_v9, %v1723_v35  ;;  %v905_v18 = vpop.f32.mrb[5].mxu1  ;;  %v1266_v37 = vpop.f32.mrb[5].mxu0 }
 0x146   : > { %v1772_v38 = vadd.f32 %v1266_v37, %v905_v18  ;;  %v1724_v39 = vpop.f32.mrb[6].mxu1  ;;  %v1764_v40 = vpop.f32.mrb[6].mxu0 }
 0x147   : > { %v1773_v42 = vadd.f32 %v1764_v40, %v1724_v39  ;;  %v908_v43 = vpop.f32.mrb[7].mxu1  ;;  %v1269_v7 = vpop.f32.mrb[7].mxu0 }
 0x148   : > { %v1774_v33 = vadd.f32 %v1269_v7, %v908_v43 }
 0x149 PF: > { %v1301_v45 = vld [vmem:[%s2075_s24] sm:$0xff]  ;;  %v1302_v46 = vld [vmem:[%s2075_s24 + $0x8] sm:$0xff]  ;;  %v1303_v47 = vld [vmem:[%s2075_s24 + $0x10] sm:$0xff]  ;;  %p1626_p10 = scmp.ne.s32.totalorder %s1939_s12, 2 }
 0x14a   : > { %v1309_v48 = vadd.f32 %v1768_v27, %v1301_v45  ;;  %v1310_v49 = vadd.f32 %v1770_v32, %v1302_v46  ;;  %v1311_v23 = vadd.f32 %v1767_v24, %v1303_v47  ;;  %v1304_v41 = vld [vmem:[%s2075_s24 + $0x18] sm:$0xff]  ;;  %v1305_v50 = vld [vmem:[%s2075_s24 + $0x20] sm:$0xff]  ;;  %v1306_v51 = vld [vmem:[%s2075_s24 + $0x28] sm:$0xff]  ;;  %vm1358_vm8 = vcmask (!%p1626_p10), 24576  }
 0x14b   : > { %v1312_v54 = vadd.f32 %v1769_v30, %v1304_v41  ;;  %v1313_v55 = vadd.f32 %v1772_v38, %v1305_v50  ;;  %v1314_v56 = vadd.f32 %v1774_v33, %v1306_v51  ;;  %v1307_v60 = vld [vmem:[%s2075_s24 + $0x30] sm:$0xff]  ;;  %v1308_v63 = vld [vmem:[%s2075_s24 + $0x38] sm:$0xff]  ;;  %1328 = sbr.rel (%p1626_p10) target bundleno = 371 (0x173), region = 36 }
 0x14c   : > { %1317 = vst.msk [vmem:[%s2075_s24] sm:$0xff] %vm402_vm3, %v1309_v48  ;;  %1318 = vst.msk [vmem:[%s2075_s24 + $0x8] sm:$0xff] %vm402_vm3, %v1310_v49  ;;  %v1315_v28 = vadd.f32 %v1771_v36, %v1307_v60  ;;  %v1316_v0 = vadd.f32 %v1773_v42, %v1308_v63 }
 0x14d   : > { %1319 = vst.msk [vmem:[%s2075_s24 + $0x10] sm:$0xff] %vm402_vm3, %v1311_v23  ;;  %1320 = vst.msk [vmem:[%s2075_s24 + $0x18] sm:$0xff] %vm402_vm3, %v1312_v54 }
 0x14e   : > { %1321 = vst.msk [vmem:[%s2075_s24 + $0x20] sm:$0xff] %vm402_vm3, %v1313_v55  ;;  %1322 = vst.msk [vmem:[%s2075_s24 + $0x28] sm:$0xff] %vm402_vm3, %v1314_v56 }
 0x14f   : > { %1323 = vst.msk [vmem:[%s2075_s24 + $0x30] sm:$0xff] %vm402_vm3, %v1315_v28  ;;  %1324 = vst.msk [vmem:[%s2075_s24 + $0x38] sm:$0xff] %vm402_vm3, %v1316_v0 }
 0x153   : > { %v1329_v4 = vld [vmem:[%s2075_s24] sm:$0xff]  ;;  %v1330_v5 = vld [vmem:[%s2075_s24 + $0x8] sm:$0xff] }
 0x154   : > { %v1331_v61 = vld [vmem:[%s2075_s24 + $0x10] sm:$0xff]  ;;  %v1332_v10 = vld [vmem:[%s2075_s24 + $0x18] sm:$0xff]  ;;  %v1337_v11 = vsel %vm402_vm3, %v1329_v4, 0.0  ;;  %v1338_v14 = vsel %vm402_vm3, %v1330_v5, 0.0  ;;  %v1360_v16 = vmul.f32 %v1329_v4, %v1329_v4  ;;  %v1361_v8 = vmul.f32 %v1330_v5, %v1330_v5 }
 0x155   : > { %v1340_v1 = vsel %vm402_vm3, %v1331_v61, 0.0  ;;  %v1333_v17 = vld [vmem:[%s2075_s24 + $0x20] sm:$0xff]  ;;  %v1339_v20 = vadd.f32 %v1338_v14, %v1337_v11  ;;  %v1342_v2 = vsel %vm402_vm3, %v1332_v10, 0.0  ;;  %v1362_v15 = vmul.f32 %v1331_v61, %v1331_v61  ;;  %v1334_v21 = vld [vmem:[%s2075_s24 + $0x28] sm:$0xff] }
 0x156   : > { %v1363_v12 = vmul.f32 %v1332_v10, %v1332_v10  ;;  %v1344_v22 = vsel %vm402_vm3, %v1333_v17, 0.0  ;;  %v1364_v31 = vmul.f32 %v1333_v17, %v1333_v17  ;;  %v1368_v34 = vsel %vm402_vm3, %v1360_v16, 0.0  ;;  %v1335_v3 = vld [vmem:[%s2075_s24 + $0x30] sm:$0xff]  ;;  %v1336_v19 = vld [vmem:[%s2075_s24 + $0x38] sm:$0xff] }
 0x157   : > { %v1341_v26 = vadd.f32 %v1340_v1, %v1339_v20  ;;  %v1369_v52 = vsel %vm402_vm3, %v1361_v8, 0.0  ;;  %v1371_v53 = vsel %vm402_vm3, %v1362_v15, 0.0  ;;  %v1346_v59 = vsel %vm402_vm3, %v1334_v21, 0.0 }
 0x158   : > { %v1370_v13 = vadd.f32 %v1369_v52, %v1368_v34  ;;  %v1365_v58 = vmul.f32 %v1334_v21, %v1334_v21  ;;  %v1373_v57 = vsel %vm402_vm3, %v1363_v12, 0.0  ;;  %v1348_v27 = vsel %vm402_vm3, %v1335_v3, 0.0 }
 0x159   : > { %v1343_v62 = vadd.f32 %v1342_v2, %v1341_v26  ;;  %v1366_v29 = vmul.f32 %v1335_v3, %v1335_v3  ;;  %v1375_v30 = vsel %vm402_vm3, %v1364_v31, 0.0  ;;  %v1350_v35 = vsel %vm402_vm3, %v1336_v19, 0.0 }
 0x15a   : > { %v1372_v25 = vadd.f32 %v1371_v53, %v1370_v13  ;;  %v1367_v9 = vmul.f32 %v1336_v19, %v1336_v19  ;;  %v1377_v36 = vsel %vm402_vm3, %v1365_v58, 0.0 }
 0x15b   : > { %v1345_v24 = vadd.f32 %v1344_v22, %v1343_v62  ;;  %v1379_v38 = vsel %vm402_vm3, %v1366_v29, 0.0 }
 0x15c   : > { %v1374_v32 = vadd.f32 %v1373_v57, %v1372_v25  ;;  %v1381_v42 = vsel %vm402_vm3, %v1367_v9, 0.0 }
 0x15d   : > { %v1347_v44 = vadd.f32 %v1346_v59, %v1345_v24 }
 0x15e   : > { %v1376_v37 = vadd.f32 %v1375_v30, %v1374_v32 }
 0x15f   : > { %v1349_v18 = vadd.f32 %v1348_v27, %v1347_v44 }
 0x160   : > { %v1378_v40 = vadd.f32 %v1377_v36, %v1376_v37 }
 0x161   : > { %v1351_v39 = vadd.f32 %v1350_v35, %v1349_v18 }
 0x162   : > { %v1380_v7 = vadd.f32 %v1379_v38, %v1378_v40 }
 0x163   : > { %v1352_v43 = vrot.slane %v1351_v39, 4 }
 0x164   : > { %v1382_v6 = vadd.f32 %v1381_v42, %v1380_v7 }
 0x165   : > { %v1353_v33 = vadd.f32 %v1352_v43, %v1351_v39 }
 0x166   : > { %v1383_v46 = vrot.slane %v1382_v6, 4 }
 0x167   : > { %v1354_v45 = vrot.slane %v1353_v33, 2 }
 0x168   : > { %v1384_v48 = vadd.f32 %v1383_v46, %v1382_v6 }
 0x169   : > { %v1355_v47 = vadd.f32 %v1354_v45, %v1353_v33 }
 0x16a   : > { %v1385_v23 = vrot.slane %v1384_v48, 2 }
 0x16b   : > { %v1356_v49 = vrot.slane %v1355_v47, 1 }
 0x16c   : > { %v1386_v50 = vadd.f32 %v1385_v23, %v1384_v48 }
 0x16d   : > { %v1357_v41 = vadd.f32 %v1356_v49, %v1355_v47 }
 0x16e   : > { %v1387_v51 = vrot.slane %v1386_v50, 1 }
 0x16f   : > { %1359 = vst.msk [vmem:[%s2087_s28] sm:$0x1] %vm1358_vm8, %v1357_v41 }
 0x170   : > { %v1388_v54 = vadd.f32 %v1387_v51, %v1386_v50 }
 0x172   : > { %1389 = vst.msk [vmem:[%s2087_s28 + $0x1] sm:$0x1] %vm1358_vm8, %v1388_v54 }
 0x173 PF: > { %s14_s18 = sadd.s32 1, %s1963_s18   ;;  %s2439_s12 = smov %s1951_s15 }
 0x174   : > { %p11_p11 = scmp.ge.s32.totalorder %s14_s18, 26   ;;  %s2440_s13 = smov %s1955_s16 }
 0x175   : > { %s2441_s14 = smov %s1959_s17  ;;  %s2442_s15 = smov %s2446_s19 }
 0x176   : > { %s2443_s16 = smov %s2450_s20  ;;  %s2444_s17 = smov %s2454_s21 }
 0x177   :  { %13 = sbr.rel (!%p11_p11) target bundleno = 4 (0x4), region = 79 }

// kernel: basic_block_forward.4
= control target key start
LH: loop header
LB: loop body
LE: loop exit
PB: predicated region body
PF: predicated region fallthrough
CT: control target
= control target key end

     0   :  { %s2112_s15 = smov 0   ;;  %s2114_s16 = smov 0   ;;  %s2648_s0 = inlined_call_operand.vmem [shape: f32[2,4,10,10,4], index: 0, kind: input, shape index: {}]   ;;  %s2649_s1 = inlined_call_operand.vmem [shape: bf16[9,4,4], index: 1, kind: input, shape index: {}]   ;;  %s2650_s2 = inlined_call_operand.vmem [shape: f32[2,4], index: 2, kind: input, shape index: {}]   ;;  %s2651_s3 = inlined_call_operand.vmem [shape: f32[2,4,64,4], index: 3, kind: output, shape index: {0}]   ;;  %s2652_s4 = inlined_call_operand.vmem [shape: f32[2,4,2,4], index: 4, kind: output, shape index: {1}]  }
   0x1   :  { %s2116_s17 = smov 0   ;;  %s2118_s18 = smov 0  }
   0x2   :  { %s2120_s19 = smov 0  }
   0x3 LB: > { %s24_s20 = sadd.s32 1, %s2076_s17  ;;  %s27_s21 = sadd.s32 1, %s2080_s18  ;;  %s2084_s19 = sphi %s2120_s19, %s15_s19   ;;  %s2080_s18 = sphi %s2118_s18, %s2660_s18   ;;  %s2076_s17 = sphi %s2116_s17, %s2659_s17   ;;  %s2072_s16 = sphi %s2114_s16, %s2658_s16   ;;  %s2068_s15 = sphi %s2112_s15, %s2657_s15  }
   0x4   : > { %p25_p0 = scmp.ge.s32.totalorder %s24_s20, 4  ;;  %p1657_p1 = scmp.ge.s32.totalorder %s2084_s19, 1 }
   0x5   : > { %p187_p2 = scmp.lt.s32.totalorder %s2084_s19, 9 }
   0x6   : > { %s2662_s20 = smov (%p25_p0, %s24_s20), 0  ;;  %s2664_s21 = smov (!%p25_p0, %s27_s21), %s2080_s18 }
   0x7   : > { %p188_p3 = pnand %p1657_p1, %p187_p2  ;;  %p29_p4 = scmp.ge.s32.totalorder %s2664_s21, 2 }
   0x8   : > { %v1682_v0 = vld [vmem:[%s2649_s1 + $0x2] sm:$0x3] (!%p188_p3)  ;;  %vm582_vm0 = vcmask (!%p188_p3), 1041408   ;;  %v2150_v1 = vld [vmem:[%s2649_s1 + $0x8] sm:$0x3] (!%p188_p3)  ;;  %p229_p5 = scmp.lt.s32.totalorder (!%p188_p3), %s2072_s16, 1  ;;  %v346_v4 = vlaneseq (!%p188_p3) }
   0x9   : > { %s2666_s21 = smov (%p29_p4, %s2664_s21), 0  ;;  %191 = sbr.rel (%p188_p3) target bundleno = 373 (0x175), region = 32 }
   0xa   : > { %1993 = vmatprep.subr.msk.bf16.mxu1 (!%p188_p3), %vm582_vm0, %v1682_v0  ;;  %1997 = vmatprep.subr.msk.bf16.mxu0 (!%p188_p3), %vm582_vm0, %v2150_v1  ;;  %v584_v2 = vsel (!%p188_p3), %vm582_vm0, %v1682_v0, 0  ;;  %v2158_v3 = vsel (!%p188_p3), %vm582_vm0, %v2150_v1, 0  ;;  %p231_p6 = scmp.lt.s32.totalorder (!%p188_p3), %s2068_s15, 3  ;;  %v2086_v5 = vmov (!%p188_p3), 0.0|0.0   ;;  %v399_v8 = vld [vmem:[%s2649_s1] sm:$0x3] (!%p188_p3) }
   0xb   : > { %1838 = vmatpush3.bf16.msra.mxu1 (!%p188_p3), %v584_v2  ;;  %1878 = vmatpush3.bf16.msra.mxu0 (!%p188_p3), %v2158_v3  ;;  %v2166_v6 = vcombine.low (!%p188_p3), %v2086_v5, %v2086_v5  ;;  %v2170_v7 = vcombine.high (!%p188_p3), %v2086_v5, %v2086_v5  ;;  %v1737_v11 = vld [vmem:[%s2649_s1 + $0xa] sm:$0x3] (!%p188_p3)  ;;  %v2186_v12 = vshrl.u32 (!%p188_p3), %v346_v4, 7  ;;  %v2193_v16 = vld [vmem:[%s2650_s2] ss:$0 sm:$0xff] (!%p188_p3)  ;;  %v2228_v35 = vsel (!%p188_p3), %vm582_vm0, %v399_v8, 0 }
   0xc   : > { %1994 = vmatprep.subr.msk.bf16.mxu1 (!%p188_p3), %vm582_vm0, %v399_v8  ;;  %1999 = vmatprep.subr.msk.bf16.mxu0 (!%p188_p3), %vm582_vm0, %v1737_v11  ;;  %v2198_v17 = vld [vmem:[%s2650_s2 + $0x1] ss:$0 sm:$0xff] (!%p188_p3)  ;;  %vm440_vm1 = vsmask.f32 (!%p188_p3), 3328  ;;  %vm441_vm2 = vsmask.f32 (!%p188_p3), 7440 }
   0xd   : > { %v444_v9 = vshrl.u32 (!%p188_p3), %v2166_v6, 16  ;;  %v447_v10 = vshll.u32 (!%p188_p3), %v2166_v6, 16  ;;  %v453_v15 = vshll.u32 (!%p188_p3), %v2170_v7, 16  ;;  %v2206_v19 = vadd.s32 (!%p188_p3), 8, %v2186_v12  ;;  %vm2223_vm4 = vmor (!%p188_p3), %vm440_vm1, %vm441_vm2 }
   0xe   : > { %vm349_vm3 = vcmp.ge.s32.totalorder (!%p188_p3), %v2186_v12, 1  ;;  %v2240_v44 = vsel (!%p188_p3), %vm582_vm0, %v1737_v11, 0  ;;  %vm569_vm6 = vcmask (!%p188_p3), 31744   ;;  %vm735_vm7 = vcmask (!%p188_p3), 1042432  }
   0xf   : > { %v446_v13 = vrot.slane (!%p188_p3), %v444_v9, 4  ;;  %v449_v14 = vrot.slane (!%p188_p3), %v447_v10, 5  ;;  %v455_v23 = vrot.slane (!%p188_p3), %v453_v15, 5  ;;  %vm356_vm5 = vcmp.le.s32.totalorder (!%p188_p3), %v2206_v19, 8 }
  0x10   : > { %s2668_s16 = smov (!%p229_p5, %s2072_s16), 1  ;;  %s2670_s15 = smov (!%p231_p6, %s2068_s15), 3  ;;  %vm736_vm8 = vcmask 1046532   ;;  %vm1479_vm10 = vcmask 24576  }
  0x11   : > { %s2004_s28 = smul.u32 80, %s2668_s16  ;;  %v450_v18 = vor.u32 %v449_v14, %v446_v13  ;;  %vm2424_vm9 = vmor %vm735_vm7, %vm736_vm8  ;;  %s1662_s13 = sshll.u32 %s2668_s16, 2 }
  0x12   : > { %s2003_s29 = smul.u32 20, %s2670_s15 }
  0x13   : > { %v451_v30 = vrot.slane %v450_v18, 4 }
  0x14   : > { %s235_s6 = sadd.s32 %s2004_s28, %s2003_s29 }
  0x15   : > { %s1658_s7 = sshll.u32 %s235_s6, 3  ;;  %v2244_v48 = vsel %vm2223_vm4, %v451_v30, %v455_v23  ;;  %s1659_s6 = sshll.u32 %s2670_s15, 3 }
  0x16   : > { %s2203_s14 = scalar_lea.vmem %s2648_s0, %s1658_s7  ;;  %s1660_s7 = sshll.u32 %s2668_s16, 5 }
  0x17   : > { %v260_v20 = vld [vmem:[%s2203_s14 + $0x10] sm:$0xff]  ;;  %v261_v21 = vld [vmem:[%s2203_s14 + $0x18] sm:$0x3]  ;;  %v274_v25 = vld [vmem:[%s2203_s14 + $0x80] sm:$0xff]  ;;  %s244_s8 = sadd.s32 %s1660_s7, %s1659_s6 }
  0x18   : > { %v272_v22 = vld [vmem:[%s2203_s14 + $0x70] sm:$0xff]  ;;  %v273_v24 = vld [vmem:[%s2203_s14 + $0x78] sm:$0x3]  ;;  %v275_v26 = vld [vmem:[%s2203_s14 + $0x88] sm:$0x3]  ;;  %v284_v27 = vmul.f32 %v2193_v16, %v260_v20  ;;  %v285_v28 = vmul.f32 %v2193_v16, %v261_v21  ;;  %v298_v32 = vmul.f32 %v2193_v16, %v274_v25  ;;  %s1661_s9 = sshll.u32 %s244_s8, 3 }
  0x19   : > { %v296_v29 = vmul.f32 %v2193_v16, %v272_v22  ;;  %v297_v31 = vmul.f32 %v2193_v16, %v273_v24  ;;  %v299_v33 = vmul.f32 %v2193_v16, %v275_v26  ;;  %v262_v39 = vld [vmem:[%s2203_s14 + $0x20] sm:$0xff]  ;;  %v263_v43 = vld [vmem:[%s2203_s14 + $0x28] sm:$0x3]  ;;  %v264_v49 = vld [vmem:[%s2203_s14 + $0x30] sm:$0xff]  ;;  %s2594_s12 = scalar_lea.vmem %s2651_s3, %s1661_s9 }
  0x1a   : > { %v308_v36 = vadd.f32 %v2198_v17, %v284_v27  ;;  %v309_v37 = vadd.f32 %v2198_v17, %v285_v28  ;;  %v322_v41 = vadd.f32 %v2198_v17, %v298_v32  ;;  %v286_v53 = vmul.f32 %v2193_v16, %v262_v39  ;;  %v265_v57 = vld [vmem:[%s2203_s14 + $0x38] sm:$0x3]  ;;  %v266_v62 = vld [vmem:[%s2203_s14 + $0x40] sm:$0xff]  ;;  %v267_v13 = vld [vmem:[%s2203_s14 + $0x48] sm:$0x3] }
  0x1b   : > { %v320_v38 = vadd.f32 %v2198_v17, %v296_v29  ;;  %v321_v40 = vadd.f32 %v2198_v17, %v297_v31  ;;  %v323_v42 = vadd.f32 %v2198_v17, %v299_v33  ;;  %v287_v58 = vmul.f32 %v2193_v16, %v263_v43 }
  0x1c   : > { %v328_v45 = vmax.f32 %v308_v36, 0.0  ;;  %v329_v46 = vmax.f32 %v309_v37, 0.0  ;;  %v342_v51 = vmax.f32 %v322_v41, 0.0  ;;  %v288_v63 = vmul.f32 %v2193_v16, %v264_v49 }
  0x1d   : > { %v340_v47 = vmax.f32 %v320_v38, 0.0  ;;  %v341_v50 = vmax.f32 %v321_v40, 0.0  ;;  %v343_v52 = vmax.f32 %v323_v42, 0.0  ;;  %v289_v14 = vmul.f32 %v2193_v16, %v265_v57 }
  0x1e   : > { %v2250_v54 = vsel %vm349_vm3, %v328_v45, 0.0  ;;  %v2254_v55 = vsel %vm356_vm5, %v329_v46, 0.0  ;;  %v2266_v60 = vsel %vm349_vm3, %v342_v51, 0.0  ;;  %v290_v21 = vmul.f32 %v2193_v16, %v266_v62 }
  0x1f   : > { %v2258_v56 = vsel %vm349_vm3, %v340_v47, 0.0  ;;  %v384_v59 = vsel %vm356_vm5, %v341_v50, 0.0  ;;  %v2270_v61 = vpack.c.bf16 %v2250_v54, %v2250_v54  ;;  %v2276_v0 = vsel %vm356_vm5, %v343_v52, 0.0 }
  0x20   : > { %v2280_v2 = vpack.c.bf16 %v2254_v55, %v2254_v55  ;;  %v2284_v4 = vpack.c.bf16 %v2258_v56, %v2258_v56  ;;  %v2286_v8 = vpack.c.bf16 %v384_v59, %v384_v59  ;;  %v2292_v11 = vpack.c.bf16 %v2266_v60, %v2266_v60 }
  0x21   : > { %v458_v9 = vshrl.u32 %v2270_v61, 16  ;;  %v461_v10 = vshll.u32 %v2270_v61, 16  ;;  %v2302_v24 = vpack.c.bf16 %v2276_v0, %v2276_v0  ;;  %v291_v29 = vmul.f32 %v2193_v16, %v267_v13 }
  0x22   : > { %v467_v15 = vshll.u32 %v2280_v2, 16  ;;  %v542_v18 = vshrl.u32 %v2284_v4, 16  ;;  %v545_v20 = vshll.u32 %v2284_v4, 16  ;;  %v972_v25 = vshrl.u32 %v2292_v11, 16 }
  0x23   : > { %v460_v22 = vrot.slane %v458_v9, 4  ;;  %v463_v23 = vrot.slane %v461_v10, 5  ;;  %v551_v28 = vshll.u32 %v2286_v8, 16  ;;  %v975_v32 = vshll.u32 %v2292_v11, 16 }
  0x24   : > { %v469_v26 = vrot.slane %v467_v15, 5  ;;  %v544_v27 = vrot.slane %v542_v18, 4  ;;  %v974_v31 = vrot.slane %v972_v25, 4  ;;  %v981_v33 = vshll.u32 %v2302_v24, 16 }
  0x25   : > { %v464_v30 = vor.u32 %v463_v23, %v460_v22  ;;  %v547_v36 = vrot.slane %v545_v20, 5  ;;  %v310_v37 = vadd.f32 %v2198_v17, %v286_v53  ;;  %v311_v38 = vadd.f32 %v2198_v17, %v287_v58 }
  0x26   : > { %v312_v39 = vadd.f32 %v2198_v17, %v288_v63  ;;  %v744_v41 = vrot.slane %v2280_v2, 5  ;;  %v977_v42 = vrot.slane %v975_v32, 5  ;;  %v313_v43 = vadd.f32 %v2198_v17, %v289_v14 }
  0x27   : > { %v465_v40 = vrot.slane %v464_v30, 4  ;;  %v983_v45 = vrot.slane %v981_v33, 5  ;;  %v314_v46 = vadd.f32 %v2198_v17, %v290_v21  ;;  %v315_v47 = vadd.f32 %v2198_v17, %v291_v29 }
  0x28   : > { %v330_v49 = vmax.f32 %v310_v37, 0.0  ;;  %v978_v51 = vor.u32 %v977_v42, %v974_v31  ;;  %v331_v52 = vmax.f32 %v311_v38, 0.0  ;;  %v332_v53 = vmax.f32 %v312_v39, 0.0 }
  0x29   : > { %v2318_v50 = vsel %vm2223_vm4, %v465_v40, %v469_v26  ;;  %v548_v57 = vor.u32 %v547_v36, %v544_v27  ;;  %v333_v59 = vmax.f32 %v313_v43, 0.0  ;;  %v334_v62 = vmax.f32 %v314_v46, 0.0  ;;  %v268_v46 = vld [vmem:[%s2203_s14 + $0x50] sm:$0xff] }
  0x2a   : > { %v1683_v58 = vcombine.low %v2244_v48, %v2318_v50  ;;  %v979_v63 = vrot.slane %v978_v51, 4  ;;  %v335_v9 = vmax.f32 %v315_v47, 0.0  ;;  %v2324_v10 = vsel %vm349_vm3, %v330_v49, 0.0 }
  0x2b   : > { %v374_v13 = vsel %vm356_vm5, %v331_v52, 0.0  ;;  %v2331_v14 = vsel %vm349_vm3, %v332_v53, 0.0  ;;  %v376_v15 = vsel %vm356_vm5, %v333_v59, 0.0  ;;  %v2337_v18 = vsel %vm349_vm3, %v334_v62, 0.0  ;;  %v269_v53 = vld [vmem:[%s2203_s14 + $0x58] sm:$0x3] }
  0x2c   : > { %1839 = vmatprep.mubr.msk.bf16.mxu1 %vm569_vm6, %v1683_v58  ;;  %v2341_v20 = vpack.c.bf16 %v2324_v10, %v2324_v10  ;;  %v2345_v21 = vsel %vm2223_vm4, %v979_v63, %v983_v45  ;;  %v378_v22 = vsel %vm356_vm5, %v335_v9, 0.0  ;;  %v2349_v23 = vpack.c.bf16 %v374_v13, %v374_v13  ;;  %v270_v9 = vld [vmem:[%s2203_s14 + $0x60] sm:$0xff]  ;;  %v271_v13 = vld [vmem:[%s2203_s14 + $0x68] sm:$0x3]  ;;  %s252_s14 = sadd.s32 %s1662_s13, %s2670_s15 }
  0x2d   : > { %v2353_v25 = vpack.c.bf16 %v2331_v14, %v2331_v14  ;;  %v2355_v26 = vrot.slane %v551_v28, 5  ;;  %v1755_v27 = vcombine.low %v2345_v21, %v2244_v48  ;;  %v2359_v29 = vpack.c.bf16 %v376_v15, %v376_v15  ;;  %s1663_s22 = sshll.u32 %s252_s14, 1 }
  0x2e   : > { %v2363_v30 = vpack.c.bf16 %v2337_v18, %v2337_v18  ;;  %v2365_v31 = vpack.c.bf16 %v378_v22, %v378_v22  ;;  %v472_v32 = vshrl.u32 %v2341_v20, 16  ;;  %v475_v33 = vshll.u32 %v2341_v20, 16  ;;  %s254_s25 = scalar_lea.vmem %s2652_s4, %s1663_s22 }
  0x2f   : > { %v481_v36 = vshll.u32 %v2349_v23, 16  ;;  %v486_v28 = vshrl.u32 %v2353_v25, 16  ;;  %v489_v37 = vshll.u32 %v2353_v25, 16  ;;  %v495_v38 = vshll.u32 %v2359_v29, 16 }
  0x30   : > { %v500_v39 = vshrl.u32 %v2363_v30, 16  ;;  %v2374_v40 = vrot.slane %v548_v57, 4  ;;  %v474_v42 = vrot.slane %v472_v32, 4  ;;  %v477_v43 = vrot.slane %v475_v33, 5 }
  0x31   : > { %v503_v45 = vshll.u32 %v2363_v30, 16  ;;  %v483_v47 = vrot.slane %v481_v36, 5  ;;  %v488_v49 = vrot.slane %v486_v28, 4  ;;  %v491_v51 = vrot.slane %v489_v37, 5 }
  0x32   : > { %v502_v52 = vrot.slane %v500_v39, 4  ;;  %v478_v58 = vor.u32 %v477_v43, %v474_v42  ;;  %v497_v59 = vrot.slane %v495_v38, 5  ;;  %v509_v63 = vshll.u32 %v2365_v31, 16 }
  0x33   : > { %v505_v62 = vrot.slane %v503_v45, 5  ;;  %v492_v15 = vor.u32 %v491_v51, %v488_v49  ;;  %v748_v57 = vrot.slane %v2349_v23, 5  ;;  %v752_v22 = vrot.slane %v2359_v29, 5 }
  0x34   : > { %v292_v32 = vmul.f32 %v2193_v16, %v268_v46  ;;  %v479_v33 = vrot.slane %v478_v58, 4  ;;  %v511_v28 = vrot.slane %v509_v63, 5  ;;  %v293_v37 = vmul.f32 %v2193_v16, %v269_v53 }
  0x35   : > { %v506_v36 = vor.u32 %v505_v62, %v502_v52  ;;  %v493_v39 = vrot.slane %v492_v15, 4  ;;  %v294_v42 = vmul.f32 %v2193_v16, %v270_v9  ;;  %v295_v43 = vmul.f32 %v2193_v16, %v271_v13  ;;  %v2414_v9 = vld [vmem:[%s2649_s1 + $0x4] sm:$0x3] }
  0x36   : > { %v316_v38 = vadd.f32 %v2198_v17, %v292_v32  ;;  %v484_v45 = vsel %vm2223_vm4, %v479_v33, %v483_v47  ;;  %v756_v29 = vrot.slane %v2365_v31, 5  ;;  %v317_v46 = vadd.f32 %v2198_v17, %v293_v37  ;;  %v1746_v33 = vld [vmem:[%s2649_s1 + $0xc] sm:$0x3] }
  0x37   : > { %v507_v23 = vrot.slane %v506_v36, 4  ;;  %v498_v49 = vsel %vm2223_vm4, %v493_v39, %v497_v59  ;;  %v1728_v51 = vcombine.low %v2318_v50, %v484_v45  ;;  %v318_v53 = vadd.f32 %v2198_v17, %v294_v42 }
  0x38   : > { %v336_v52 = vmax.f32 %v316_v38, 0.0  ;;  %v2401_v16 = vcombine.low %v484_v45, %v498_v49  ;;  %v337_v47 = vmax.f32 %v317_v46, 0.0  ;;  %v319_v62 = vadd.f32 %v2198_v17, %v295_v43 }
  0x39   : > { %v2399_v58 = vsel %vm2223_vm4, %v507_v23, %v511_v28  ;;  %1879 = vmatprep.mubr.msk.bf16.mxu0 %vm569_vm6, %v1728_v51  ;;  %v338_v50 = vmax.f32 %v318_v53, 0.0  ;;  %v1700_v63 = vrot.slane %v2270_v61, 9  ;;  %v1701_v61 = vrot.slane %v2341_v20, 9 }
  0x3a   : > { %v1729_v31 = vcombine.low %v498_v49, %v2399_v58  ;;  %v2408_v59 = vsel %vm349_vm3, %v336_v52, 0.0  ;;  %1840 = vmatmul.mubr.msk.bf16.vlgmr.msra.gmra.mrb[0].mxu1 %vm569_vm6, %v2401_v16  ;;  %v380_v17 = vsel %vm356_vm5, %v337_v47, 0.0  ;;  %v339_v15 = vmax.f32 %v319_v62, 0.0 }
  0x3b   : > { %v1777_v13 = vpack.c.bf16 %v2408_v59, %v2408_v59  ;;  %1848 = vmatpush3.bf16.msra.mxu1 %v2228_v35  ;;  %v1778_v36 = vpack.c.bf16 %v380_v17, %v380_v17  ;;  %v2436_v28 = vsel %vm349_vm3, %v338_v50, 0.0  ;;  %v1702_v37 = vrot.slane %v2353_v25, 9 }
  0x3c   : > { %1880 = vmatmul.mubr.msk.bf16.vlgmr.msra.gmra.mrb[0].mxu0 %vm569_vm6, %v1729_v31  ;;  %v1703_v39 = vrot.slane %v2363_v30, 9  ;;  %v382_v42 = vsel %vm356_vm5, %v339_v15, 0.0  ;;  %v1779_v35 = vpack.c.bf16 %v2436_v28, %v2436_v28  ;;  %1995 = vmatprep.subr.msk.bf16.mxu1 %vm582_vm0, %v2414_v9  ;;  %v2451_v25 = vsel %vm2424_vm9, %v1700_v63, %v744_v41 }
  0x3d   : > { %1888 = vmatpush3.bf16.msra.mxu0 %v2240_v44  ;;  %v514_v20 = vshrl.u32 %v1777_v13, 16  ;;  %v517_v38 = vshll.u32 %v1777_v13, 16  ;;  %v523_v12 = vshll.u32 %v1778_v36, 16  ;;  %v1780_v43 = vpack.c.bf16 %v382_v42, %v382_v42 }
  0x3e   : > { %v2455_v44 = vsel %vm2424_vm9, %v1701_v61, %v748_v57  ;;  %2000 = vmatprep.subr.msk.bf16.mxu0 %vm582_vm0, %v1746_v33  ;;  %v528_v45 = vshrl.u32 %v1779_v35, 16  ;;  %v531_v23 = vshll.u32 %v1779_v35, 16  ;;  %v2460_v51 = vsel %vm2424_vm9, %v1702_v37, %v752_v22 }
  0x3f   : > { %v516_v19 = vrot.slane %v514_v20, 4  ;;  %v519_v30 = vrot.slane %v517_v38, 5  ;;  %v525_v46 = vrot.slane %v523_v12, 5  ;;  %v537_v49 = vshll.u32 %v1780_v43, 16 }
  0x40   : > { %v2464_v2 = vsel %vm2424_vm9, %v1703_v39, %v756_v29  ;;  %v530_v52 = vrot.slane %v528_v45, 4  ;;  %v533_v57 = vrot.slane %v531_v23, 5  ;;  %v1738_v53 = vcombine.low %v2451_v25, %v2455_v44 }
  0x41   : > { %v520_v41 = vor.u32 %v519_v30, %v516_v19  ;;  %v2472_v47 = vsel %vm2223_vm4, %v2374_v40, %v2355_v26  ;;  %v539_v62 = vrot.slane %v537_v49, 5  ;;  %v1188_v22 = vsel %vm582_vm0, %v1746_v33, 0 }
  0x42   : > { %v390_v31 = vpack.c.bf16 %v2254_v55, %v2250_v54  ;;  %v534_v50 = vor.u32 %v533_v57, %v530_v52  ;;  %1889 = vmatprep.mubr.msk.bf16.mxu0 %vm569_vm6, %v1738_v53  ;;  %v1704_v63 = vrot.slane %v1777_v13, 9  ;;  %v760_v17 = vrot.slane %v1778_v36, 5 }
  0x43   : > { %v521_v29 = vrot.slane %v520_v41, 4  ;;  %v1739_v15 = vcombine.low %v2460_v51, %v2464_v2  ;;  %v1705_v61 = vrot.slane %v1779_v35, 9  ;;  %v764_v37 = vrot.slane %v1780_v43, 5 }
  0x44   : > { %v1706_v26 = vrot.slane %v2284_v4, 9  ;;  %v535_v33 = vrot.slane %v534_v50, 4  ;;  %v761_v55 = vsel %vm2424_vm9, %v1704_v63, %v760_v17  ;;  %v768_v39 = vrot.slane %v2286_v8, 5  ;;  %v1754_v8 = vld [vmem:[%s2649_s1 + $0xe] sm:$0x3] }
  0x45   : > { %v2483_v40 = vsel %vm2223_vm4, %v521_v29, %v525_v46  ;;  %v765_v36 = vsel %vm2424_vm9, %v1705_v61, %v764_v37  ;;  %v1736_v20 = vrot.slane %v2292_v11, 9  ;;  %v1082_v4 = vrot.slane %v2302_v24, 5  ;;  %v1716_v46 = vld [vmem:[%s2649_s1 + $0x6] sm:$0x3] }
  0x46   : > { %v1685_v13 = vcombine.low %v2399_v58, %v2483_v40  ;;  %v2496_v38 = vsel %vm2223_vm4, %v535_v33, %v539_v62  ;;  %v1691_v42 = vcombine.low %v2086_v5, %v390_v31  ;;  %v1740_v35 = vcombine.low %v761_v55, %v765_v36 }
  0x47   : > { %v1686_v58 = vcombine.low %v2496_v38, %v2472_v47  ;;  %v769_v34 = vsel %vm2424_vm9, %v1706_v26, %v768_v39  ;;  %v1083_v11 = vsel %vm2424_vm9, %v1736_v20, %v1082_v4  ;;  %v1787_v24 = vpack.c.bf16 %v2337_v18, %v2331_v14 }
  0x48   : > { %1843 = vmatprep.mubr.msk.bf16.mxu1 %vm569_vm6, %v1685_v13  ;;  %1890 = vmatmul.mubr.msk.bf16.vlgmr.msra.gmra.mrb[0].mxu0 %vm569_vm6, %v1739_v15  ;;  %v1741_v12 = vcombine.low %v769_v34, %v1083_v11  ;;  %v1783_v43 = vpack.c.bf16 %v2331_v14, %v2324_v10  ;;  %v1784_v19 = vpack.c.bf16 %v2408_v59, %v2337_v18  ;;  %v740_v30 = vrot.slane %v2170_v7, 5 }
  0x49   : > { %1898 = vmatpush3.bf16.msra.mxu0 %v1188_v22  ;;  %1893 = vmatprep.mubr.msk.bf16.mxu0 %vm569_vm6, %v1740_v35  ;;  %v797_v45 = vsel %vm582_vm0, %v2414_v9, 0  ;;  %v1699_v23 = vrot.slane %v2166_v6, 9  ;;  %v1785_v14 = vpack.c.bf16 %v2258_v56, %v2436_v28  ;;  %v1288_v6 = vsel %vm582_vm0, %v1754_v8, 0  ;;  %v1761_v9 = vld [vmem:[%s2649_s1 + $0x10] sm:$0x3] }
  0x4a   : > { %1844 = vmatmul.mubr.msk.bf16.gmra.mrb[4].mxu1 %vm569_vm6, %v1686_v58  ;;  %2001 = vmatprep.subr.msk.bf16.mxu0 %vm582_vm0, %v1754_v8  ;;  %v397_v49 = vpack.c.bf16 %v2276_v0, %v2266_v60  ;;  %v1710_v41 = vcombine.low %v2464_v2, %v761_v55  ;;  %v893_v52 = vsel %vm582_vm0, %v1716_v46, 0  ;;  %v1375_v0 = vsel %vm582_vm0, %v1761_v9, 0 }
  0x4b   : > { %1849 = vmatprep.mubr.msk.bf16.mxu1 %vm569_vm6, %v1691_v42  ;;  %v741_v7 = vsel %vm2424_vm9, %v1699_v23, %v740_v30 }
  0x4c   : > { %v1708_v18 = vcombine.low %v741_v7, %v2451_v25  ;;  %v1747_v32 = vcombine.low %v397_v49, %v2086_v5  ;;  %v1709_v25 = vcombine.low %v2455_v44, %v2460_v51  ;;  %v1711_v5 = vcombine.low %v765_v36, %v769_v34 }
  0x4d   : > { %v1786_v44 = vpack.c.bf16 %v2324_v10, %v2250_v54  ;;  %v1730_v54 = vcombine.low %v2483_v40, %v2496_v38  ;;  %v1762_v48 = vcombine.low %v1083_v11, %v741_v7 }
  0x50   : > { %1894 = vmatmul.mubr.msk.bf16.gmra.mrb[4].mxu0 %vm569_vm6, %v1741_v12 }
  0x51   : > { %1899 = vmatprep.mubr.msk.bf16.mxu0 %vm569_vm6, %v1783_v43 }
  0x52   : > { %1850 = vmatmul.mubr.msk.bf16.vlgmr.msra.gmra.mrb[0].mxu1 %vm569_vm6, %v1783_v43 }
  0x53   : > { %1858 = vmatpush3.bf16.msra.mxu1 %v797_v45  ;;  %1853 = vmatprep.mubr.msk.bf16.mxu1 %vm569_vm6, %v1784_v19 }
  0x54   : > { %1996 = vmatprep.subr.msk.bf16.mxu1 %vm582_vm0, %v1716_v46 }
  0x58   : > { %1900 = vmatmul.mubr.msk.bf16.vlgmr.msra.gmra.mrb[0].mxu0 %vm569_vm6, %v1784_v19 }
  0x59   : > { %1908 = vmatpush3.bf16.msra.mxu0 %v1288_v6  ;;  %1903 = vmatprep.mubr.msk.bf16.mxu0 %vm569_vm6, %v1785_v14 }
  0x5a   : > { %1854 = vmatmul.mubr.msk.bf16.gmra.mrb[4].mxu1 %vm569_vm6, %v1785_v14  ;;  %2002 = vmatprep.subr.msk.bf16.mxu0 %vm582_vm0, %v1761_v9 }
  0x5b   : > { %1859 = vmatprep.mubr.msk.bf16.mxu1 %vm569_vm6, %v1708_v18 }
  0x60   : > { %1904 = vmatmul.mubr.msk.bf16.gmra.mrb[4].mxu0 %vm569_vm6, %v1747_v32 }
  0x61   : > { %1909 = vmatprep.mubr.msk.bf16.mxu0 %vm569_vm6, %v2401_v16  ;;  %v1788_v16 = vpack.c.bf16 %v2436_v28, %v2408_v59 }
  0x62   : > { %1860 = vmatmul.mubr.msk.bf16.vlgmr.msra.gmra.mrb[0].mxu1 %vm569_vm6, %v1709_v25 }
  0x63   : > { %1868 = vmatpush3.bf16.msra.mxu1 %v893_v52  ;;  %1863 = vmatprep.mubr.msk.bf16.mxu1 %vm569_vm6, %v1710_v41 }
  0x64   : > { %1998 = vmatprep.subr.msk.bf16.mxu1 %vm582_vm0, %v2150_v1  ;;  %v1789_v1 = vpack.c.bf16 %v2266_v60, %v2258_v56 }
  0x68   : > { %1910 = vmatmul.mubr.msk.bf16.vlgmr.msra.gmra.mrb[0].mxu0 %vm569_vm6, %v1685_v13 }
  0x69   : > { %1918 = vmatpush3.bf16.msra.mxu0 %v1375_v0  ;;  %1913 = vmatprep.mubr.msk.bf16.mxu0 %vm569_vm6, %v1686_v58 }
  0x6a   : > { %1864 = vmatmul.mubr.msk.bf16.gmra.mrb[4].mxu1 %vm569_vm6, %v1711_v5 }
  0x6b   : > { %1869 = vmatprep.mubr.msk.bf16.mxu1 %vm569_vm6, %v1786_v44 }
  0x70   : > { %1914 = vmatmul.mubr.msk.bf16.gmra.mrb[4].mxu0 %vm569_vm6, %v1755_v27 }
  0x71   : > { %1919 = vmatprep.mubr.msk.bf16.mxu0 %vm569_vm6, %v1709_v25 }
  0x72   : > { %1870 = vmatmul.mubr.msk.bf16.vlgmr.msra.gmra.mrb[0].mxu1 %vm569_vm6, %v1787_v24 }
  0x73   : > { %1928 = vmatpush3.bf16.msra.mxu1 %v2158_v3  ;;  %1873 = vmatprep.mubr.msk.bf16.mxu1 %vm569_vm6, %v1788_v16  ;;  %v1731_v3 = vcombine.low %v2472_v47, %v2345_v21 }
  0x78   : > { %1920 = vmatmul.mubr.msk.bf16.vlgmr.msra.gmra.mrb[0].mxu0 %vm569_vm6, %v1710_v41 }
  0x79   : > { %1923 = vmatprep.mubr.msk.bf16.mxu0 %vm569_vm6, %v1711_v5 }
  0x7a   : > { %1874 = vmatmul.mubr.msk.bf16.gmra.mrb[4].mxu1 %vm569_vm6, %v1789_v1 }
  0x7b   : > { %1883 = vmatprep.mubr.msk.bf16.mxu1 %vm569_vm6, %v1730_v54 }
  0x80   : > { %1924 = vmatmul.mubr.msk.bf16.gmra.mrb[4].mxu0 %vm569_vm6, %v1762_v48 }
  0x86   : > { %1884 = vmatmul.mubr.msk.bf16.vlgmr.msra.gmra.mrb[4].mxu1 %vm569_vm6, %v1731_v3 }
 0x145   : > { %v1871_v56 = vpop.f32.mrb[0].mxu1 }
 0x146   : > { %v929_v60 = vpop.f32.mrb[1].mxu1 }
 0x147   : > { %v1872_v10 = vpop.f32.mrb[2].mxu1 }
 0x148   : > { %v932_v27 = vpop.f32.mrb[3].mxu1 }
 0x14b   : > { %v1921_v21 = vpop.f32.mrb[0].mxu0 }
 0x14c   : > { %v1929_v59 = vadd.f32 %v1921_v21, %v1871_v56  ;;  %v1411_v28 = vpop.f32.mrb[1].mxu0 }
 0x14d   : > { %v1930_v51 = vadd.f32 %v1411_v28, %v929_v60  ;;  %v1922_v2 = vpop.f32.mrb[2].mxu0 }
 0x14e   : > { %1452 = vst.msk [vmem:[%s2594_s12 + $0x10] sm:$0xff] %vm569_vm6, %v1929_v59  ;;  %v1931_v57 = vadd.f32 %v1922_v2, %v1872_v10  ;;  %v1414_v53 = vpop.f32.mrb[3].mxu0  ;;  %v1483_v22 = vmul.f32 %v1929_v59, %v1929_v59  ;;  %v1461_v17 = vsel %vm569_vm6, %v1929_v59, 0.0 }
 0x14f   : > { %1450 = vst.msk [vmem:[%s2594_s12] sm:$0xff] %vm569_vm6, %v1930_v51  ;;  %v1481_v47 = vmul.f32 %v1930_v51, %v1930_v51  ;;  %v1932_v62 = vadd.f32 %v1414_v53, %v932_v27  ;;  %v1458_v31 = vsel %vm569_vm6, %v1930_v51, 0.0 }
 0x150   : > { %1453 = vst.msk [vmem:[%s2594_s12 + $0x18] sm:$0xff] %vm569_vm6, %v1931_v57  ;;  %v1484_v61 = vmul.f32 %v1931_v57, %v1931_v57  ;;  %v1492_v39 = vsel %vm569_vm6, %v1483_v22, 0.0  ;;  %v1463_v13 = vsel %vm569_vm6, %v1931_v57, 0.0 }
 0x151   : > { %1451 = vst.msk [vmem:[%s2594_s12 + $0x8] sm:$0xff] %vm569_vm6, %v1932_v62  ;;  %v1459_v29 = vsel %vm569_vm6, %v1932_v62, 0.0  ;;  %v1482_v50 = vmul.f32 %v1932_v62, %v1932_v62  ;;  %v1489_v15 = vsel %vm569_vm6, %v1481_v47, 0.0 }
 0x152   : > { %v1460_v63 = vadd.f32 %v1459_v29, %v1458_v31  ;;  %v1494_v42 = vsel %vm569_vm6, %v1484_v61, 0.0 }
 0x153   : > { %v1490_v37 = vsel %vm569_vm6, %v1482_v50, 0.0  ;;  %v1925_v26 = vpop.f32.mrb[4].mxu0 }
 0x154   : > { %v1462_v40 = vadd.f32 %v1461_v17, %v1460_v63  ;;  %v1491_v33 = vadd.f32 %v1490_v37, %v1489_v15  ;;  %v1427_v55 = vpop.f32.mrb[5].mxu0 }
 0x155   : > { %v1926_v36 = vpop.f32.mrb[6].mxu0 }
 0x156   : > { %v1493_v20 = vadd.f32 %v1492_v39, %v1491_v33  ;;  %v1464_v4 = vadd.f32 %v1463_v13, %v1462_v40  ;;  %v1430_v38 = vpop.f32.mrb[7].mxu0 }
 0x158   : > { %v1495_v35 = vadd.f32 %v1494_v42, %v1493_v20 }
 0x159   : > { %v1885_v8 = vpop.f32.mrb[4].mxu1 }
 0x15a   : > { %v1933_v58 = vadd.f32 %v1925_v26, %v1885_v8  ;;  %v1057_v34 = vpop.f32.mrb[5].mxu1 }
 0x15b   : > { %v1934_v11 = vadd.f32 %v1427_v55, %v1057_v34  ;;  %v1886_v24 = vpop.f32.mrb[6].mxu1 }
 0x15c   : > { %1456 = vst.msk [vmem:[%s2594_s12 + $0x30] sm:$0xff] %vm569_vm6, %v1933_v58  ;;  %v1935_v12 = vadd.f32 %v1926_v36, %v1886_v24  ;;  %v1060_v43 = vpop.f32.mrb[7].mxu1  ;;  %v1487_v46 = vmul.f32 %v1933_v58, %v1933_v58  ;;  %v1469_v49 = vsel %vm569_vm6, %v1933_v58, 0.0 }
 0x15d   : > { %1454 = vst.msk [vmem:[%s2594_s12 + $0x20] sm:$0xff] %vm569_vm6, %v1934_v11  ;;  %v1465_v19 = vsel %vm569_vm6, %v1934_v11, 0.0  ;;  %v1485_v30 = vmul.f32 %v1934_v11, %v1934_v11  ;;  %v1936_v45 = vadd.f32 %v1430_v38, %v1060_v43 }
 0x15e   : > { %v1466_v23 = vadd.f32 %v1465_v19, %v1464_v4  ;;  %1457 = vst.msk [vmem:[%s2594_s12 + $0x38] sm:$0xff] %vm569_vm6, %v1935_v12  ;;  %v1488_v32 = vmul.f32 %v1935_v12, %v1935_v12  ;;  %v1500_v5 = vsel %vm569_vm6, %v1487_v46, 0.0  ;;  %v1471_v0 = vsel %vm569_vm6, %v1935_v12, 0.0 }
 0x15f   : > { %v1496_v7 = vsel %vm569_vm6, %v1485_v30, 0.0  ;;  %1455 = vst.msk [vmem:[%s2594_s12 + $0x28] sm:$0xff] %vm569_vm6, %v1936_v45  ;;  %v1467_v14 = vsel %vm569_vm6, %v1936_v45, 0.0  ;;  %v1486_v6 = vmul.f32 %v1936_v45, %v1936_v45 }
 0x160   : > { %v1497_v18 = vadd.f32 %v1496_v7, %v1495_v35  ;;  %v1468_v9 = vadd.f32 %v1467_v14, %v1466_v23  ;;  %v1502_v1 = vsel %vm569_vm6, %v1488_v32, 0.0 }
 0x161   : > { %v1498_v25 = vsel %vm569_vm6, %v1486_v6, 0.0 }
 0x162   : > { %v1470_v41 = vadd.f32 %v1469_v49, %v1468_v9  ;;  %v1499_v52 = vadd.f32 %v1498_v25, %v1497_v18 }
 0x164   : > { %v1472_v44 = vadd.f32 %v1471_v0, %v1470_v41  ;;  %v1501_v16 = vadd.f32 %v1500_v5, %v1499_v52 }
 0x166   : > { %v1473_v54 = vrot.slane %v1472_v44, 4  ;;  %v1503_v48 = vadd.f32 %v1502_v1, %v1501_v16 }
 0x168   : > { %v1474_v3 = vadd.f32 %v1473_v54, %v1472_v44  ;;  %v1504_v56 = vrot.slane %v1503_v48, 4 }
 0x16a   : > { %v1475_v60 = vrot.slane %v1474_v3, 2  ;;  %v1505_v10 = vadd.f32 %v1504_v56, %v1503_v48 }
 0x16c   : > { %v1476_v27 = vadd.f32 %v1475_v60, %v1474_v3  ;;  %v1506_v21 = vrot.slane %v1505_v10, 2 }
 0x16e   : > { %v1477_v59 = vrot.slane %v1476_v27, 1  ;;  %v1507_v28 = vadd.f32 %v1506_v21, %v1505_v10 }
 0x170   : > { %v1478_v51 = vadd.f32 %v1477_v59, %v1476_v27  ;;  %v1508_v2 = vrot.slane %v1507_v28, 1 }
 0x172   : > { %1480 = vst.msk [vmem:[%s254_s25] sm:$0x1] %vm1479_vm10, %v1478_v51  ;;  %v1509_v57 = vadd.f32 %v1508_v2, %v1507_v28 }
 0x174   : > { %1510 = vst.msk [vmem:[%s254_s25 + $0x1] sm:$0x1] %vm1479_vm10, %v1509_v57 }
 0x175 PF: > { %s15_s19 = sadd.s32 1, %s2084_s19   ;;  %s2657_s15 = smov %s2076_s17 }
 0x176   : > { %p12_p7 = scmp.ge.s32.totalorder %s15_s19, 10   ;;  %s2658_s16 = smov %s2080_s18 }
 0x177   : > { %s2659_s17 = smov %s2662_s20  ;;  %s2660_s18 = smov %s2666_s21 }
 0x178   :  { %14 = sbr.rel (!%p12_p7) target bundleno = 3 (0x3), region = 82 }

</bundles_post_ra>
